<compile_context>
chip_gen: v7x
topology: tpu7x:2x2x1
jax: 0.10.0
libtpu: 0.0.40
codegen_flags: <defaults>
</compile_context>

<pallas_src>
import functools

import jax
import jax.numpy as jnp
from jax.experimental import pallas as pl
from jax.experimental.pallas import tpu as pltpu


KPAD = 8  # embedding input features padded 3 -> 8 (sublane granule)


# ---------------------------------------------------------------------------
# Fused encoder kernel
# ---------------------------------------------------------------------------
def _add_instance_norm(a, b, w, bias, Bblk, N, E):
    # Matches Add_And_Normalization_Module: InstanceNorm1d(E, affine=True) over
    # the node axis N per (batch, channel); biased variance, eps=1e-5.
    # Single-pass: var = E[x^2] - mean^2.
    added = (a + b).reshape(Bblk, N, E)
    mean = jnp.mean(added, axis=1, keepdims=True)
    meansq = jnp.mean(added * added, axis=1, keepdims=True)
    var = meansq - mean * mean
    normed = (added - mean) * jax.lax.rsqrt(var + 1e-5)
    out = normed * w.reshape(1, 1, E) + bias.reshape(1, 1, E)
    return out.reshape(Bblk * N, E)


def _kp_encoder_kernel(Bblk, N, E, H, D, L,
                       data_ref, emb_w_ref, emb_b_ref,
                       wqkvo_ref, bo_ref, n1w_ref, n1b_ref,
                       w1_ref, b1_ref, w2_ref, b2_ref, n2w_ref, n2b_ref,
                       out_ref):
    BN = Bblk * N
    HD = H * D
    scale = 1.0 / (float(D) ** 0.5)
    bf16 = jnp.bfloat16

    # ---- embedding MoE (experts gate-mixed into one linear in the wrapper) ----
    x = jnp.dot(data_ref[...].astype(bf16), emb_w_ref[...],
                preferred_element_type=jnp.float32) + emb_b_ref[...]

    for l in range(L):
        xb = x.astype(bf16)

        # ---- one fused projection: lanes = [Q (H*D) | K (H*D) | V@Wo (H*E)] ----
        proj = jnp.dot(xb, wqkvo_ref[l], preferred_element_type=jnp.float32)

        # ---- head-batched attention over G = H*Bblk ----
        q = jnp.concatenate(
            [proj[:, h * D:(h + 1) * D].reshape(Bblk, N, D) for h in range(H)],
            axis=0).astype(bf16)                                   # (G, N, D)
        k = jnp.concatenate(
            [proj[:, HD + h * D: HD + (h + 1) * D].reshape(Bblk, N, D)
             for h in range(H)], axis=0).astype(bf16)              # (G, N, D)
        v = jnp.concatenate(
            [proj[:, 2 * HD + h * E: 2 * HD + (h + 1) * E].reshape(Bblk, N, E)
             for h in range(H)], axis=0).astype(bf16)              # (G, N, E)

        s = jnp.einsum("gnd,gmd->gnm", q, k,
                       preferred_element_type=jnp.float32) * scale
        s = s - jnp.max(s, axis=-1, keepdims=True)
        p = jnp.exp(s)
        p = p / jnp.sum(p, axis=-1, keepdims=True)                 # exact softmax
        o = jnp.einsum("gnm,gme->gne", p.astype(bf16), v,
                       preferred_element_type=jnp.float32)         # (G, N, E)

        # multi_head_combine == sum over heads (Wo already folded into V)
        mh = o[0:Bblk]
        for h in range(1, H):
            mh = mh + o[h * Bblk:(h + 1) * Bblk]
        mh = mh.reshape(BN, E) + bo_ref[l]

        out1 = _add_instance_norm(x, mh, n1w_ref[l], n1b_ref[l], Bblk, N, E)

        # ---- MoE FF: top-k experts pre-gathered + gate-scaled -> 2 matmuls ----
        h1 = jnp.dot(out1.astype(bf16), w1_ref[l],
                     preferred_element_type=jnp.float32) + b1_ref[l]
        h1 = jnp.maximum(h1, 0.0)
        y = jnp.dot(h1.astype(bf16), w2_ref[l],
                    preferred_element_type=jnp.float32) + b2_ref[l]

        x = _add_instance_norm(out1, y, n2w_ref[l], n2b_ref[l], Bblk, N, E)

    out_ref[...] = x


def _full_spec(shape):
    nd = len(shape)
    return pl.BlockSpec(shape, lambda i, _nd=nd: (0,) * _nd)


def fused_kp_encoder(data_pad, emb_w, emb_b, wqkvo, bo, n1w, n1b,
                     w1c, b1c, w2c, b2c, n2w, n2b,
                     *, B, N, E, H, D, L, b_block):
    kernel = functools.partial(_kp_encoder_kernel, b_block, N, E, H, D, L)
    rows = b_block * N
    weights = (emb_w, emb_b, wqkvo, bo, n1w, n1b, w1c, b1c, w2c, b2c, n2w, n2b)
    return pl.pallas_call(
        kernel,
        out_shape=jax.ShapeDtypeStruct((B * N, E), jnp.float32),
        grid=(B // b_block,),
        in_specs=[pl.BlockSpec((rows, KPAD), lambda i: (i, 0))]
                 + [_full_spec(w.shape) for w in weights],
        out_specs=pl.BlockSpec((rows, E), lambda i: (i, 0)),
        compiler_params=pltpu.CompilerParams(
            dimension_semantics=("parallel",)),   # v7x: both TCs split the batch
    )(data_pad, emb_w, emb_b, wqkvo, bo, n1w, n1b,
      w1c, b1c, w2c, b2c, n2w, n2b)


def _pick_b_block(B, N, target_rows=256):
    # Smallest divisor of B whose block fills >= target_rows MXU rows (and keeps
    # the sublane dim a multiple of 8); otherwise the whole batch in one block.
    for d in range(1, B + 1):
        if B % d == 0 and d * N >= target_rows and (d * N) % 8 == 0:
            return d
    return B


# ---------------------------------------------------------------------------
# MoE gating + parameter packing (tiny, plain JAX, jitted with the forward)
# ---------------------------------------------------------------------------
def _top_k_gates(logits, k):
    # TODO(synk): original MoE noisy top-k gating (+ load-balancing aux loss,
    # routing_level / routing_method handling) is not provided; deterministic
    # preference-routed top-k softmax gating is used instead.
    top_vals, top_idx = jax.lax.top_k(logits, k)
    return jax.nn.softmax(top_vals, axis=-1), top_idx


def pack_params(params, model_params):
    E = model_params["embedding_dim"]
    H = model_params["head_num"]
    D = model_params["qkv_dim"]
    layers = params["layers"]
    stk = lambda name: jnp.stack([lp[name] for lp in layers])

    def fuse_qkvo(lp):
        # Fold multi_head_combine into V: Wvo_h = Wv_h @ Wo_h  (exact).
        wv_r = lp["wv"].reshape(E, H, D)
        wo_r = lp["wo"].reshape(H, D, E)
        wvo = jnp.einsum("ehd,hdf->ehf", wv_r, wo_r).reshape(E, H * E)
        return jnp.concatenate([lp["wq"], lp["wk"], wvo], axis=1)  # (E, 2HD+HE)

    return {
        "wqkvo": jnp.stack([fuse_qkvo(lp) for lp in layers]).astype(jnp.bfloat16),
        "bo": stk("bo")[:, None, :],                 # (L, 1, E)
        "n1w": stk("norm1_w")[:, None, :],
        "n1b": stk("norm1_b")[:, None, :],
        "n2w": stk("norm2_w")[:, None, :],
        "n2b": stk("norm2_b")[:, None, :],
        "gate_w": stk("gate_w"),                     # (L, P, NE)
        "gate_b": stk("gate_b"),                     # (L, NE)
        "w1": stk("w1"), "b1": stk("b1"),            # (L, NE, E, FF) / (L, NE, FF)
        "w2": stk("w2"), "b2": stk("b2"),            # (L, NE, FF, E) / (L, NE, E)
    }


def kp_encoder_forward(params, packed, model_params, data, pref):
    B, N, _ = data.shape
    E = model_params["embedding_dim"]
    H = model_params["head_num"]
    D = model_params["qkv_dim"]
    FF = model_params["ff_hidden_dim"]
    L = model_params["encoder_layer_num"]
    TOPK = model_params["topk"]

    # ---- embedding MoE ('Linear' experts mix exactly into one linear) ----
    emb = params["emb"]
    g_emb, idx_emb = _top_k_gates(pref @ emb["gate_w"] + emb["gate_b"], TOPK)
    w_emb = jnp.einsum("k,kio->io", g_emb, emb["w"][idx_emb])            # (3, E)
    b_emb = jnp.einsum("k,ko->o", g_emb, emb["b"][idx_emb]).reshape(1, E)
    w_emb = jnp.pad(w_emb, ((0, KPAD - 3), (0, 0))).astype(jnp.bfloat16)  # (8, E)
    data_pad = jnp.pad(data.reshape(B * N, 3), ((0, 0), (0, KPAD - 3)))

    # ---- per-layer MoE gating; gather top-k experts, fold gates into W2/b2 ----
    logits = jnp.einsum("p,lpe->le", pref, packed["gate_w"]) + packed["gate_b"]
    gates, top_idx = _top_k_gates(logits, TOPK)                          # (L, K)
    w1g = jnp.take_along_axis(packed["w1"], top_idx[:, :, None, None], axis=1)
    b1g = jnp.take_along_axis(packed["b1"], top_idx[:, :, None], axis=1)
    w2g = jnp.take_along_axis(packed["w2"], top_idx[:, :, None, None], axis=1)
    b2g = jnp.take_along_axis(packed["b2"], top_idx[:, :, None], axis=1)

    w1c = jnp.transpose(w1g, (0, 2, 1, 3)).reshape(L, E, TOPK * FF).astype(jnp.bfloat16)
    b1c = b1g.reshape(L, 1, TOPK * FF)
    w2c = (gates[:, :, None, None] * w2g).reshape(L, TOPK * FF, E).astype(jnp.bfloat16)
    b2c = jnp.einsum("lk,lke->le", gates, b2g).reshape(L, 1, E)

    b_block = _pick_b_block(B, N)
    out2d = fused_kp_encoder(
        data_pad, w_emb, b_emb,
        packed["wqkvo"], packed["bo"], packed["n1w"], packed["n1b"],
        w1c, b1c, w2c, b2c, packed["n2w"], packed["n2b"],
        B=B, N=N, E=E, H=H, D=D, L=L, b_block=b_block)

    # TODO(synk): MoE aux/load-balancing loss not reproducible without the MoE source.
    moe_loss = jnp.float32(0.0)
    return out2d.reshape(B, N, E), moe_loss


# ---------------------------------------------------------------------------
# Deterministic parameter init
# ---------------------------------------------------------------------------
def init_params(key, model_params, pref_dim=8):
    E = model_params["embedding_dim"]
    H = model_params["head_num"]
    D = model_params["qkv_dim"]
    FF = model_params["ff_hidden_dim"]
    NE = model_params["num_experts"]
    L = model_params["encoder_layer_num"]

    def nrm(k, shape, scale=0.1):
        return scale * jax.random.normal(k, shape, jnp.float32)

    keys = jax.random.split(key, 1 + L)

    ek = keys[0]
    emb = {
        "gate_w": nrm(jax.random.fold_in(ek, 0), (pref_dim, NE)),
        "gate_b": nrm(jax.random.fold_in(ek, 1), (NE,)),
        "w": nrm(jax.random.fold_in(ek, 2), (NE, 3, E)),
        "b": nrm(jax.random.fold_in(ek, 3), (NE, E)),
    }

    layers = []
    for li in range(L):
        k = keys[1 + li]
        nk = lambda i, k=k: jax.random.fold_in(k, i)
        layers.append(
            {
                "wq": nrm(nk(0), (E, H * D)),
                "wk": nrm(nk(1), (E, H * D)),
                "wv": nrm(nk(2), (E, H * D)),
                "wo": nrm(nk(3), (H * D, E)),
                "bo": nrm(nk(4), (E,)),
                "norm1_w": jnp.ones((E,), jnp.float32),
                "norm1_b": jnp.zeros((E,), jnp.float32),
                "gate_w": nrm(nk(5), (pref_dim, NE)),
                "gate_b": nrm(nk(6), (NE,)),
                "w1": nrm(nk(7), (NE, E, FF)),
                "b1": nrm(nk(8), (NE, FF)),
                "w2": nrm(nk(9), (NE, FF, E)),
                "b2": nrm(nk(10), (NE, E)),
                "norm2_w": jnp.ones((E,), jnp.float32),
                "norm2_b": jnp.zeros((E,), jnp.float32),
            }
        )
    return {"emb": emb, "layers": layers}


# ---------------------------------------------------------------------------
if __name__ == "__main__":
    model_params = dict(
        embedding_dim=32,
        head_num=4,
        qkv_dim=8,
        ff_hidden_dim=64,
        num_experts=4,
        topk=2,
        encoder_layer_num=2,
        routing_level="problem",
        routing_method="input_choice",
    )

    key = jax.random.PRNGKey(0)
    kparams, kdata, kpref = jax.random.split(key, 3)

    params = init_params(kparams, model_params)
    packed = pack_params(params, model_params)

    B, N = 2, 8
    data = jax.random.uniform(kdata, (B, N, 3), jnp.float32)      # knapsack (w, v, ratio)
    mid_embd_pref = jax.random.uniform(kpref, (8,), jnp.float32)  # preference embedding

    @jax.jit
    def fwd(params, packed, data, pref):
        return kp_encoder_forward(params, packed, model_params, data, pref)

    out, moe_loss = fwd(params, packed, data, mid_embd_pref)
    jax.block_until_ready(out)
    jax.block_until_ready(moe_loss)

    assert out.shape == (B, N, model_params["embedding_dim"])
    assert bool(jnp.all(jnp.isfinite(out)))
    print("KERNEL_OK")
</pallas_src>

<mosaic_0001>
module attributes {stable_mosaic.version = 11 : i64} {
  func.func @_kp_encoder_kernel(%arg0: i32, %arg1: memref<16x8xf32, #tpu.memory_space<vmem>>, %arg2: memref<8x32xbf16, #tpu.memory_space<vmem>>, %arg3: memref<1x32xf32, #tpu.memory_space<vmem>>, %arg4: memref<2x32x192xbf16, #tpu.memory_space<vmem>>, %arg5: memref<2x1x32xf32, #tpu.memory_space<vmem>>, %arg6: memref<2x1x32xf32, #tpu.memory_space<vmem>>, %arg7: memref<2x1x32xf32, #tpu.memory_space<vmem>>, %arg8: memref<2x32x128xbf16, #tpu.memory_space<vmem>>, %arg9: memref<2x1x128xf32, #tpu.memory_space<vmem>>, %arg10: memref<2x128x32xbf16, #tpu.memory_space<vmem>>, %arg11: memref<2x1x32xf32, #tpu.memory_space<vmem>>, %arg12: memref<2x1x32xf32, #tpu.memory_space<vmem>>, %arg13: memref<2x1x32xf32, #tpu.memory_space<vmem>>, %arg14: memref<16x32xf32, #tpu.memory_space<vmem>>) attributes {dimension_semantics = [#tpu.dimension_semantics<parallel>], iteration_bounds = array<i64: 1>, scalar_prefetch = 0 : i64, scratch_operands = 0 : i64, tpu.core_type = #tpu.core_type<tc>, window_params = [{transform_indices = @transform_0, window_bounds = array<i64: 16, 8>}, {pipeline_mode = #tpu.pipeline_mode<synchronous>, transform_indices = @transform_1, window_bounds = array<i64: 8, 32>}, {pipeline_mode = #tpu.pipeline_mode<synchronous>, transform_indices = @transform_2, window_bounds = array<i64: 1, 32>}, {pipeline_mode = #tpu.pipeline_mode<synchronous>, transform_indices = @transform_3, window_bounds = array<i64: 2, 32, 192>}, {pipeline_mode = #tpu.pipeline_mode<synchronous>, transform_indices = @transform_4, window_bounds = array<i64: 2, 1, 32>}, {pipeline_mode = #tpu.pipeline_mode<synchronous>, transform_indices = @transform_5, window_bounds = array<i64: 2, 1, 32>}, {pipeline_mode = #tpu.pipeline_mode<synchronous>, transform_indices = @transform_6, window_bounds = array<i64: 2, 1, 32>}, {pipeline_mode = #tpu.pipeline_mode<synchronous>, transform_indices = @transform_7, window_bounds = array<i64: 2, 32, 128>}, {pipeline_mode = #tpu.pipeline_mode<synchronous>, transform_indices = @transform_8, window_bounds = array<i64: 2, 1, 128>}, {pipeline_mode = #tpu.pipeline_mode<synchronous>, transform_indices = @transform_9, window_bounds = array<i64: 2, 128, 32>}, {pipeline_mode = #tpu.pipeline_mode<synchronous>, transform_indices = @transform_10, window_bounds = array<i64: 2, 1, 32>}, {pipeline_mode = #tpu.pipeline_mode<synchronous>, transform_indices = @transform_11, window_bounds = array<i64: 2, 1, 32>}, {pipeline_mode = #tpu.pipeline_mode<synchronous>, transform_indices = @transform_12, window_bounds = array<i64: 2, 1, 32>}, {transform_indices = @transform_13, window_bounds = array<i64: 16, 32>}]} {
    %c0 = arith.constant 0 : index
    %c0_0 = arith.constant 0 : index
    %0 = vector.load %arg1[%c0, %c0_0] : memref<16x8xf32, #tpu.memory_space<vmem>>, vector<16x8xf32>
    %1 = arith.truncf %0 : vector<16x8xf32> to vector<16x8xbf16>
    %c0_1 = arith.constant 0 : index
    %c0_2 = arith.constant 0 : index
    %2 = vector.load %arg2[%c0_1, %c0_2] : memref<8x32xbf16, #tpu.memory_space<vmem>>, vector<8x32xbf16>
    %cst = arith.constant dense<0.000000e+00> : vector<16x32xf32>
    %3 = tpu.matmul %1, %2, %cst {dimension_numbers = #tpu.dot_dimension_numbers<[1], [0], [0], [1], [0, 0, 1, 1], [], []>} : vector<16x8xbf16>, vector<8x32xbf16>, vector<16x32xf32> -> vector<16x32xf32>
    %c0_3 = arith.constant 0 : index
    %c0_4 = arith.constant 0 : index
    %4 = vector.load %arg3[%c0_3, %c0_4] : memref<1x32xf32, #tpu.memory_space<vmem>>, vector<1x32xf32>
    %5 = vector.broadcast %4 : vector<1x32xf32> to vector<16x32xf32>
    %6 = arith.addf %3, %5 : vector<16x32xf32>
    %7 = arith.truncf %6 : vector<16x32xf32> to vector<16x32xbf16>
    %c0_5 = arith.constant 0 : index
    %c0_6 = arith.constant 0 : index
    %c0_7 = arith.constant 0 : index
    %8 = vector.load %arg4[%c0_5, %c0_6, %c0_7] : memref<2x32x192xbf16, #tpu.memory_space<vmem>>, vector<1x32x192xbf16>
    %9 = vector.shape_cast %8 : vector<1x32x192xbf16> to vector<32x192xbf16>
    %cst_8 = arith.constant dense<0.000000e+00> : vector<16x192xf32>
    %10 = tpu.matmul %7, %9, %cst_8 {dimension_numbers = #tpu.dot_dimension_numbers<[1], [0], [0], [1], [0, 0, 1, 1], [], []>} : vector<16x32xbf16>, vector<32x192xbf16>, vector<16x192xf32> -> vector<16x192xf32>
    %11 = vector.extract_strided_slice %10 {offsets = [0, 0], sizes = [16, 8], strides = [1, 1]} : vector<16x192xf32> to vector<16x8xf32>
    %12 = vector.shape_cast %11 : vector<16x8xf32> to vector<2x8x8xf32>
    %13 = vector.extract_strided_slice %10 {offsets = [0, 8], sizes = [16, 8], strides = [1, 1]} : vector<16x192xf32> to vector<16x8xf32>
    %14 = vector.shape_cast %13 : vector<16x8xf32> to vector<2x8x8xf32>
    %15 = vector.extract_strided_slice %10 {offsets = [0, 16], sizes = [16, 8], strides = [1, 1]} : vector<16x192xf32> to vector<16x8xf32>
    %16 = vector.shape_cast %15 : vector<16x8xf32> to vector<2x8x8xf32>
    %17 = vector.extract_strided_slice %10 {offsets = [0, 24], sizes = [16, 8], strides = [1, 1]} : vector<16x192xf32> to vector<16x8xf32>
    %18 = vector.shape_cast %17 : vector<16x8xf32> to vector<2x8x8xf32>
    %19 = tpu.concatenate %12, %14, %16, %18 in 0 : vector<2x8x8xf32>, vector<2x8x8xf32>, vector<2x8x8xf32>, vector<2x8x8xf32> -> vector<8x8x8xf32>
    %20 = arith.truncf %19 : vector<8x8x8xf32> to vector<8x8x8xbf16>
    %21 = vector.extract_strided_slice %10 {offsets = [0, 32], sizes = [16, 8], strides = [1, 1]} : vector<16x192xf32> to vector<16x8xf32>
    %22 = vector.shape_cast %21 : vector<16x8xf32> to vector<2x8x8xf32>
    %23 = vector.extract_strided_slice %10 {offsets = [0, 40], sizes = [16, 8], strides = [1, 1]} : vector<16x192xf32> to vector<16x8xf32>
    %24 = vector.shape_cast %23 : vector<16x8xf32> to vector<2x8x8xf32>
    %25 = vector.extract_strided_slice %10 {offsets = [0, 48], sizes = [16, 8], strides = [1, 1]} : vector<16x192xf32> to vector<16x8xf32>
    %26 = vector.shape_cast %25 : vector<16x8xf32> to vector<2x8x8xf32>
    %27 = vector.extract_strided_slice %10 {offsets = [0, 56], sizes = [16, 8], strides = [1, 1]} : vector<16x192xf32> to vector<16x8xf32>
    %28 = vector.shape_cast %27 : vector<16x8xf32> to vector<2x8x8xf32>
    %29 = tpu.concatenate %22, %24, %26, %28 in 0 : vector<2x8x8xf32>, vector<2x8x8xf32>, vector<2x8x8xf32>, vector<2x8x8xf32> -> vector<8x8x8xf32>
    %30 = arith.truncf %29 : vector<8x8x8xf32> to vector<8x8x8xbf16>
    %31 = vector.extract_strided_slice %10 {offsets = [0, 64], sizes = [16, 32], strides = [1, 1]} : vector<16x192xf32> to vector<16x32xf32>
    %32 = vector.shape_cast %31 : vector<16x32xf32> to vector<2x8x32xf32>
    %33 = vector.extract_strided_slice %10 {offsets = [0, 96], sizes = [16, 32], strides = [1, 1]} : vector<16x192xf32> to vector<16x32xf32>
    %34 = vector.shape_cast %33 : vector<16x32xf32> to vector<2x8x32xf32>
    %35 = vector.extract_strided_slice %10 {offsets = [0, 128], sizes = [16, 32], strides = [1, 1]} : vector<16x192xf32> to vector<16x32xf32>
    %36 = vector.shape_cast %35 : vector<16x32xf32> to vector<2x8x32xf32>
    %37 = vector.extract_strided_slice %10 {offsets = [0, 160], sizes = [16, 32], strides = [1, 1]} : vector<16x192xf32> to vector<16x32xf32>
    %38 = vector.shape_cast %37 : vector<16x32xf32> to vector<2x8x32xf32>
    %39 = tpu.concatenate %32, %34, %36, %38 in 0 : vector<2x8x32xf32>, vector<2x8x32xf32>, vector<2x8x32xf32>, vector<2x8x32xf32> -> vector<8x8x32xf32>
    %40 = arith.truncf %39 : vector<8x8x32xf32> to vector<8x8x32xbf16>
    "tpu.trace_start"() <{level = 10 : i32, message = "gnd,gmd->gnm"}> : () -> ()
    %cst_9 = arith.constant dense<0.000000e+00> : vector<8x8x8xf32>
    %41 = tpu.matmul %20, %30, %cst_9 {dimension_numbers = #tpu.dot_dimension_numbers<[2], [2], [1], [1], [0, 0, 0, 1, 1, 1], [0], [0]>} : vector<8x8x8xbf16>, vector<8x8x8xbf16>, vector<8x8x8xf32> -> vector<8x8x8xf32>
    "tpu.trace_stop"() : () -> ()
    %cst_10 = arith.constant 0.353553385 : f32
    %42 = vector.broadcast %cst_10 : f32 to vector<8x8x8xf32>
    %43 = arith.mulf %41, %42 : vector<8x8x8xf32>
    %cst_11 = arith.constant dense<0xFF800000> : vector<8x8xf32>
    %44 = vector.multi_reduction <maximumf>, %43, %cst_11 [2] : vector<8x8x8xf32> to vector<8x8xf32>
    %45 = vector.shape_cast %44 : vector<8x8xf32> to vector<8x8x1xf32>
    %46 = vector.broadcast %45 : vector<8x8x1xf32> to vector<8x8x8xf32>
    %47 = arith.subf %43, %46 : vector<8x8x8xf32>
    %48 = math.exp %47 : vector<8x8x8xf32>
    %cst_12 = arith.constant dense<0.000000e+00> : vector<8x8xf32>
    %49 = vector.multi_reduction <add>, %48, %cst_12 [2] : vector<8x8x8xf32> to vector<8x8xf32>
    %50 = vector.shape_cast %49 : vector<8x8xf32> to vector<8x8x1xf32>
    %51 = vector.broadcast %50 : vector<8x8x1xf32> to vector<8x8x8xf32>
    %52 = arith.divf %48, %51 : vector<8x8x8xf32>
    %53 = arith.truncf %52 : vector<8x8x8xf32> to vector<8x8x8xbf16>
    "tpu.trace_start"() <{level = 10 : i32, message = "gnm,gme->gne"}> : () -> ()
    %cst_13 = arith.constant dense<0.000000e+00> : vector<8x8x32xf32>
    %54 = tpu.matmul %53, %40, %cst_13 {dimension_numbers = #tpu.dot_dimension_numbers<[2], [1], [1], [2], [0, 0, 0, 1, 1, 2], [0], [0]>} : vector<8x8x8xbf16>, vector<8x8x32xbf16>, vector<8x8x32xf32> -> vector<8x8x32xf32>
    "tpu.trace_stop"() : () -> ()
    %55 = vector.extract_strided_slice %54 {offsets = [0, 0, 0], sizes = [2, 8, 32], strides = [1, 1, 1]} : vector<8x8x32xf32> to vector<2x8x32xf32>
    %56 = vector.extract_strided_slice %54 {offsets = [2, 0, 0], sizes = [2, 8, 32], strides = [1, 1, 1]} : vector<8x8x32xf32> to vector<2x8x32xf32>
    %57 = arith.addf %55, %56 : vector<2x8x32xf32>
    %58 = vector.extract_strided_slice %54 {offsets = [4, 0, 0], sizes = [2, 8, 32], strides = [1, 1, 1]} : vector<8x8x32xf32> to vector<2x8x32xf32>
    %59 = arith.addf %57, %58 : vector<2x8x32xf32>
    %60 = vector.extract_strided_slice %54 {offsets = [6, 0, 0], sizes = [2, 8, 32], strides = [1, 1, 1]} : vector<8x8x32xf32> to vector<2x8x32xf32>
    %61 = arith.addf %59, %60 : vector<2x8x32xf32>
    %62 = vector.shape_cast %61 : vector<2x8x32xf32> to vector<16x32xf32>
    %c0_14 = arith.constant 0 : index
    %c0_15 = arith.constant 0 : index
    %c0_16 = arith.constant 0 : index
    %63 = vector.load %arg5[%c0_14, %c0_15, %c0_16] : memref<2x1x32xf32, #tpu.memory_space<vmem>>, vector<1x1x32xf32>
    %64 = vector.shape_cast %63 : vector<1x1x32xf32> to vector<1x32xf32>
    %65 = vector.broadcast %64 : vector<1x32xf32> to vector<16x32xf32>
    %66 = arith.addf %62, %65 : vector<16x32xf32>
    %c0_17 = arith.constant 0 : index
    %c0_18 = arith.constant 0 : index
    %c0_19 = arith.constant 0 : index
    %67 = vector.load %arg6[%c0_17, %c0_18, %c0_19] : memref<2x1x32xf32, #tpu.memory_space<vmem>>, vector<1x1x32xf32>
    %68 = vector.shape_cast %67 : vector<1x1x32xf32> to vector<1x32xf32>
    %c0_20 = arith.constant 0 : index
    %c0_21 = arith.constant 0 : index
    %c0_22 = arith.constant 0 : index
    %69 = vector.load %arg7[%c0_20, %c0_21, %c0_22] : memref<2x1x32xf32, #tpu.memory_space<vmem>>, vector<1x1x32xf32>
    %70 = vector.shape_cast %69 : vector<1x1x32xf32> to vector<1x32xf32>
    %71 = arith.addf %6, %66 : vector<16x32xf32>
    %72 = vector.shape_cast %71 : vector<16x32xf32> to vector<2x8x32xf32>
    %cst_23 = arith.constant dense<0.000000e+00> : vector<2x32xf32>
    %73 = vector.multi_reduction <add>, %72, %cst_23 [1] : vector<2x8x32xf32> to vector<2x32xf32>
    %74 = vector.shape_cast %73 : vector<2x32xf32> to vector<2x1x32xf32>
    %cst_24 = arith.constant 8.000000e+00 : f32
    %75 = vector.broadcast %cst_24 : f32 to vector<2x1x32xf32>
    %76 = arith.divf %74, %75 : vector<2x1x32xf32>
    %77 = arith.mulf %72, %72 : vector<2x8x32xf32>
    %cst_25 = arith.constant dense<0.000000e+00> : vector<2x32xf32>
    %78 = vector.multi_reduction <add>, %77, %cst_25 [1] : vector<2x8x32xf32> to vector<2x32xf32>
    %79 = vector.shape_cast %78 : vector<2x32xf32> to vector<2x1x32xf32>
    %cst_26 = arith.constant 8.000000e+00 : f32
    %80 = vector.broadcast %cst_26 : f32 to vector<2x1x32xf32>
    %81 = arith.divf %79, %80 : vector<2x1x32xf32>
    %82 = arith.mulf %76, %76 : vector<2x1x32xf32>
    %83 = arith.subf %81, %82 : vector<2x1x32xf32>
    %84 = vector.broadcast %76 : vector<2x1x32xf32> to vector<2x8x32xf32>
    %85 = arith.subf %72, %84 : vector<2x8x32xf32>
    %cst_27 = arith.constant 9.99999974E-6 : f32
    %86 = vector.broadcast %cst_27 : f32 to vector<2x1x32xf32>
    %87 = arith.addf %83, %86 : vector<2x1x32xf32>
    %88 = math.rsqrt %87 : vector<2x1x32xf32>
    %89 = vector.broadcast %88 : vector<2x1x32xf32> to vector<2x8x32xf32>
    %90 = arith.mulf %85, %89 : vector<2x8x32xf32>
    %91 = vector.shape_cast %68 : vector<1x32xf32> to vector<1x1x32xf32>
    %92 = vector.broadcast %91 : vector<1x1x32xf32> to vector<2x8x32xf32>
    %93 = arith.mulf %90, %92 : vector<2x8x32xf32>
    %94 = vector.shape_cast %70 : vector<1x32xf32> to vector<1x1x32xf32>
    %95 = vector.broadcast %94 : vector<1x1x32xf32> to vector<2x8x32xf32>
    %96 = arith.addf %93, %95 : vector<2x8x32xf32>
    %97 = vector.shape_cast %96 : vector<2x8x32xf32> to vector<16x32xf32>
    %98 = arith.truncf %97 : vector<16x32xf32> to vector<16x32xbf16>
    %c0_28 = arith.constant 0 : index
    %c0_29 = arith.constant 0 : index
    %c0_30 = arith.constant 0 : index
    %99 = vector.load %arg8[%c0_28, %c0_29, %c0_30] : memref<2x32x128xbf16, #tpu.memory_space<vmem>>, vector<1x32x128xbf16>
    %100 = vector.shape_cast %99 : vector<1x32x128xbf16> to vector<32x128xbf16>
    %cst_31 = arith.constant dense<0.000000e+00> : vector<16x128xf32>
    %101 = tpu.matmul %98, %100, %cst_31 {dimension_numbers = #tpu.dot_dimension_numbers<[1], [0], [0], [1], [0, 0, 1, 1], [], []>} : vector<16x32xbf16>, vector<32x128xbf16>, vector<16x128xf32> -> vector<16x128xf32>
    %c0_32 = arith.constant 0 : index
    %c0_33 = arith.constant 0 : index
    %c0_34 = arith.constant 0 : index
    %102 = vector.load %arg9[%c0_32, %c0_33, %c0_34] : memref<2x1x128xf32, #tpu.memory_space<vmem>>, vector<1x1x128xf32>
    %103 = vector.shape_cast %102 : vector<1x1x128xf32> to vector<1x128xf32>
    %104 = vector.broadcast %103 : vector<1x128xf32> to vector<16x128xf32>
    %105 = arith.addf %101, %104 : vector<16x128xf32>
    %cst_35 = arith.constant 0.000000e+00 : f32
    %106 = vector.broadcast %cst_35 : f32 to vector<16x128xf32>
    %107 = arith.maximumf %105, %106 : vector<16x128xf32>
    %108 = arith.truncf %107 : vector<16x128xf32> to vector<16x128xbf16>
    %c0_36 = arith.constant 0 : index
    %c0_37 = arith.constant 0 : index
    %c0_38 = arith.constant 0 : index
    %109 = vector.load %arg10[%c0_36, %c0_37, %c0_38] : memref<2x128x32xbf16, #tpu.memory_space<vmem>>, vector<1x128x32xbf16>
    %110 = vector.shape_cast %109 : vector<1x128x32xbf16> to vector<128x32xbf16>
    %cst_39 = arith.constant dense<0.000000e+00> : vector<16x32xf32>
    %111 = tpu.matmul %108, %110, %cst_39 {dimension_numbers = #tpu.dot_dimension_numbers<[1], [0], [0], [1], [0, 0, 1, 1], [], []>} : vector<16x128xbf16>, vector<128x32xbf16>, vector<16x32xf32> -> vector<16x32xf32>
    %c0_40 = arith.constant 0 : index
    %c0_41 = arith.constant 0 : index
    %c0_42 = arith.constant 0 : index
    %112 = vector.load %arg11[%c0_40, %c0_41, %c0_42] : memref<2x1x32xf32, #tpu.memory_space<vmem>>, vector<1x1x32xf32>
    %113 = vector.shape_cast %112 : vector<1x1x32xf32> to vector<1x32xf32>
    %114 = vector.broadcast %113 : vector<1x32xf32> to vector<16x32xf32>
    %115 = arith.addf %111, %114 : vector<16x32xf32>
    %c0_43 = arith.constant 0 : index
    %c0_44 = arith.constant 0 : index
    %c0_45 = arith.constant 0 : index
    %116 = vector.load %arg12[%c0_43, %c0_44, %c0_45] : memref<2x1x32xf32, #tpu.memory_space<vmem>>, vector<1x1x32xf32>
    %117 = vector.shape_cast %116 : vector<1x1x32xf32> to vector<1x32xf32>
    %c0_46 = arith.constant 0 : index
    %c0_47 = arith.constant 0 : index
    %c0_48 = arith.constant 0 : index
    %118 = vector.load %arg13[%c0_46, %c0_47, %c0_48] : memref<2x1x32xf32, #tpu.memory_space<vmem>>, vector<1x1x32xf32>
    %119 = vector.shape_cast %118 : vector<1x1x32xf32> to vector<1x32xf32>
    %120 = arith.addf %97, %115 : vector<16x32xf32>
    %121 = vector.shape_cast %120 : vector<16x32xf32> to vector<2x8x32xf32>
    %cst_49 = arith.constant dense<0.000000e+00> : vector<2x32xf32>
    %122 = vector.multi_reduction <add>, %121, %cst_49 [1] : vector<2x8x32xf32> to vector<2x32xf32>
    %123 = vector.shape_cast %122 : vector<2x32xf32> to vector<2x1x32xf32>
    %cst_50 = arith.constant 8.000000e+00 : f32
    %124 = vector.broadcast %cst_50 : f32 to vector<2x1x32xf32>
    %125 = arith.divf %123, %124 : vector<2x1x32xf32>
    %126 = arith.mulf %121, %121 : vector<2x8x32xf32>
    %cst_51 = arith.constant dense<0.000000e+00> : vector<2x32xf32>
    %127 = vector.multi_reduction <add>, %126, %cst_51 [1] : vector<2x8x32xf32> to vector<2x32xf32>
    %128 = vector.shape_cast %127 : vector<2x32xf32> to vector<2x1x32xf32>
    %cst_52 = arith.constant 8.000000e+00 : f32
    %129 = vector.broadcast %cst_52 : f32 to vector<2x1x32xf32>
    %130 = arith.divf %128, %129 : vector<2x1x32xf32>
    %131 = arith.mulf %125, %125 : vector<2x1x32xf32>
    %132 = arith.subf %130, %131 : vector<2x1x32xf32>
    %133 = vector.broadcast %125 : vector<2x1x32xf32> to vector<2x8x32xf32>
    %134 = arith.subf %121, %133 : vector<2x8x32xf32>
    %cst_53 = arith.constant 9.99999974E-6 : f32
    %135 = vector.broadcast %cst_53 : f32 to vector<2x1x32xf32>
    %136 = arith.addf %132, %135 : vector<2x1x32xf32>
    %137 = math.rsqrt %136 : vector<2x1x32xf32>
    %138 = vector.broadcast %137 : vector<2x1x32xf32> to vector<2x8x32xf32>
    %139 = arith.mulf %134, %138 : vector<2x8x32xf32>
    %140 = vector.shape_cast %117 : vector<1x32xf32> to vector<1x1x32xf32>
    %141 = vector.broadcast %140 : vector<1x1x32xf32> to vector<2x8x32xf32>
    %142 = arith.mulf %139, %141 : vector<2x8x32xf32>
    %143 = vector.shape_cast %119 : vector<1x32xf32> to vector<1x1x32xf32>
    %144 = vector.broadcast %143 : vector<1x1x32xf32> to vector<2x8x32xf32>
    %145 = arith.addf %142, %144 : vector<2x8x32xf32>
    %146 = vector.shape_cast %145 : vector<2x8x32xf32> to vector<16x32xf32>
    %147 = arith.truncf %146 : vector<16x32xf32> to vector<16x32xbf16>
    %c1 = arith.constant 1 : index
    %c0_54 = arith.constant 0 : index
    %c0_55 = arith.constant 0 : index
    %148 = vector.load %arg4[%c1, %c0_54, %c0_55] : memref<2x32x192xbf16, #tpu.memory_space<vmem>>, vector<1x32x192xbf16>
    %149 = vector.shape_cast %148 : vector<1x32x192xbf16> to vector<32x192xbf16>
    %cst_56 = arith.constant dense<0.000000e+00> : vector<16x192xf32>
    %150 = tpu.matmul %147, %149, %cst_56 {dimension_numbers = #tpu.dot_dimension_numbers<[1], [0], [0], [1], [0, 0, 1, 1], [], []>} : vector<16x32xbf16>, vector<32x192xbf16>, vector<16x192xf32> -> vector<16x192xf32>
    %151 = vector.extract_strided_slice %150 {offsets = [0, 0], sizes = [16, 8], strides = [1, 1]} : vector<16x192xf32> to vector<16x8xf32>
    %152 = vector.shape_cast %151 : vector<16x8xf32> to vector<2x8x8xf32>
    %153 = vector.extract_strided_slice %150 {offsets = [0, 8], sizes = [16, 8], strides = [1, 1]} : vector<16x192xf32> to vector<16x8xf32>
    %154 = vector.shape_cast %153 : vector<16x8xf32> to vector<2x8x8xf32>
    %155 = vector.extract_strided_slice %150 {offsets = [0, 16], sizes = [16, 8], strides = [1, 1]} : vector<16x192xf32> to vector<16x8xf32>
    %156 = vector.shape_cast %155 : vector<16x8xf32> to vector<2x8x8xf32>
    %157 = vector.extract_strided_slice %150 {offsets = [0, 24], sizes = [16, 8], strides = [1, 1]} : vector<16x192xf32> to vector<16x8xf32>
    %158 = vector.shape_cast %157 : vector<16x8xf32> to vector<2x8x8xf32>
    %159 = tpu.concatenate %152, %154, %156, %158 in 0 : vector<2x8x8xf32>, vector<2x8x8xf32>, vector<2x8x8xf32>, vector<2x8x8xf32> -> vector<8x8x8xf32>
    %160 = arith.truncf %159 : vector<8x8x8xf32> to vector<8x8x8xbf16>
    %161 = vector.extract_strided_slice %150 {offsets = [0, 32], sizes = [16, 8], strides = [1, 1]} : vector<16x192xf32> to vector<16x8xf32>
    %162 = vector.shape_cast %161 : vector<16x8xf32> to vector<2x8x8xf32>
    %163 = vector.extract_strided_slice %150 {offsets = [0, 40], sizes = [16, 8], strides = [1, 1]} : vector<16x192xf32> to vector<16x8xf32>
    %164 = vector.shape_cast %163 : vector<16x8xf32> to vector<2x8x8xf32>
    %165 = vector.extract_strided_slice %150 {offsets = [0, 48], sizes = [16, 8], strides = [1, 1]} : vector<16x192xf32> to vector<16x8xf32>
    %166 = vector.shape_cast %165 : vector<16x8xf32> to vector<2x8x8xf32>
    %167 = vector.extract_strided_slice %150 {offsets = [0, 56], sizes = [16, 8], strides = [1, 1]} : vector<16x192xf32> to vector<16x8xf32>
    %168 = vector.shape_cast %167 : vector<16x8xf32> to vector<2x8x8xf32>
    %169 = tpu.concatenate %162, %164, %166, %168 in 0 : vector<2x8x8xf32>, vector<2x8x8xf32>, vector<2x8x8xf32>, vector<2x8x8xf32> -> vector<8x8x8xf32>
    %170 = arith.truncf %169 : vector<8x8x8xf32> to vector<8x8x8xbf16>
    %171 = vector.extract_strided_slice %150 {offsets = [0, 64], sizes = [16, 32], strides = [1, 1]} : vector<16x192xf32> to vector<16x32xf32>
    %172 = vector.shape_cast %171 : vector<16x32xf32> to vector<2x8x32xf32>
    %173 = vector.extract_strided_slice %150 {offsets = [0, 96], sizes = [16, 32], strides = [1, 1]} : vector<16x192xf32> to vector<16x32xf32>
    %174 = vector.shape_cast %173 : vector<16x32xf32> to vector<2x8x32xf32>
    %175 = vector.extract_strided_slice %150 {offsets = [0, 128], sizes = [16, 32], strides = [1, 1]} : vector<16x192xf32> to vector<16x32xf32>
    %176 = vector.shape_cast %175 : vector<16x32xf32> to vector<2x8x32xf32>
    %177 = vector.extract_strided_slice %150 {offsets = [0, 160], sizes = [16, 32], strides = [1, 1]} : vector<16x192xf32> to vector<16x32xf32>
    %178 = vector.shape_cast %177 : vector<16x32xf32> to vector<2x8x32xf32>
    %179 = tpu.concatenate %172, %174, %176, %178 in 0 : vector<2x8x32xf32>, vector<2x8x32xf32>, vector<2x8x32xf32>, vector<2x8x32xf32> -> vector<8x8x32xf32>
    %180 = arith.truncf %179 : vector<8x8x32xf32> to vector<8x8x32xbf16>
    "tpu.trace_start"() <{level = 10 : i32, message = "gnd,gmd->gnm"}> : () -> ()
    %cst_57 = arith.constant dense<0.000000e+00> : vector<8x8x8xf32>
    %181 = tpu.matmul %160, %170, %cst_57 {dimension_numbers = #tpu.dot_dimension_numbers<[2], [2], [1], [1], [0, 0, 0, 1, 1, 1], [0], [0]>} : vector<8x8x8xbf16>, vector<8x8x8xbf16>, vector<8x8x8xf32> -> vector<8x8x8xf32>
    "tpu.trace_stop"() : () -> ()
    %cst_58 = arith.constant 0.353553385 : f32
    %182 = vector.broadcast %cst_58 : f32 to vector<8x8x8xf32>
    %183 = arith.mulf %181, %182 : vector<8x8x8xf32>
    %cst_59 = arith.constant dense<0xFF800000> : vector<8x8xf32>
    %184 = vector.multi_reduction <maximumf>, %183, %cst_59 [2] : vector<8x8x8xf32> to vector<8x8xf32>
    %185 = vector.shape_cast %184 : vector<8x8xf32> to vector<8x8x1xf32>
    %186 = vector.broadcast %185 : vector<8x8x1xf32> to vector<8x8x8xf32>
    %187 = arith.subf %183, %186 : vector<8x8x8xf32>
    %188 = math.exp %187 : vector<8x8x8xf32>
    %cst_60 = arith.constant dense<0.000000e+00> : vector<8x8xf32>
    %189 = vector.multi_reduction <add>, %188, %cst_60 [2] : vector<8x8x8xf32> to vector<8x8xf32>
    %190 = vector.shape_cast %189 : vector<8x8xf32> to vector<8x8x1xf32>
    %191 = vector.broadcast %190 : vector<8x8x1xf32> to vector<8x8x8xf32>
    %192 = arith.divf %188, %191 : vector<8x8x8xf32>
    %193 = arith.truncf %192 : vector<8x8x8xf32> to vector<8x8x8xbf16>
    "tpu.trace_start"() <{level = 10 : i32, message = "gnm,gme->gne"}> : () -> ()
    %cst_61 = arith.constant dense<0.000000e+00> : vector<8x8x32xf32>
    %194 = tpu.matmul %193, %180, %cst_61 {dimension_numbers = #tpu.dot_dimension_numbers<[2], [1], [1], [2], [0, 0, 0, 1, 1, 2], [0], [0]>} : vector<8x8x8xbf16>, vector<8x8x32xbf16>, vector<8x8x32xf32> -> vector<8x8x32xf32>
    "tpu.trace_stop"() : () -> ()
    %195 = vector.extract_strided_slice %194 {offsets = [0, 0, 0], sizes = [2, 8, 32], strides = [1, 1, 1]} : vector<8x8x32xf32> to vector<2x8x32xf32>
    %196 = vector.extract_strided_slice %194 {offsets = [2, 0, 0], sizes = [2, 8, 32], strides = [1, 1, 1]} : vector<8x8x32xf32> to vector<2x8x32xf32>
    %197 = arith.addf %195, %196 : vector<2x8x32xf32>
    %198 = vector.extract_strided_slice %194 {offsets = [4, 0, 0], sizes = [2, 8, 32], strides = [1, 1, 1]} : vector<8x8x32xf32> to vector<2x8x32xf32>
    %199 = arith.addf %197, %198 : vector<2x8x32xf32>
    %200 = vector.extract_strided_slice %194 {offsets = [6, 0, 0], sizes = [2, 8, 32], strides = [1, 1, 1]} : vector<8x8x32xf32> to vector<2x8x32xf32>
    %201 = arith.addf %199, %200 : vector<2x8x32xf32>
    %202 = vector.shape_cast %201 : vector<2x8x32xf32> to vector<16x32xf32>
    %c1_62 = arith.constant 1 : index
    %c0_63 = arith.constant 0 : index
    %c0_64 = arith.constant 0 : index
    %203 = vector.load %arg5[%c1_62, %c0_63, %c0_64] : memref<2x1x32xf32, #tpu.memory_space<vmem>>, vector<1x1x32xf32>
    %204 = vector.shape_cast %203 : vector<1x1x32xf32> to vector<1x32xf32>
    %205 = vector.broadcast %204 : vector<1x32xf32> to vector<16x32xf32>
    %206 = arith.addf %202, %205 : vector<16x32xf32>
    %c1_65 = arith.constant 1 : index
    %c0_66 = arith.constant 0 : index
    %c0_67 = arith.constant 0 : index
    %207 = vector.load %arg6[%c1_65, %c0_66, %c0_67] : memref<2x1x32xf32, #tpu.memory_space<vmem>>, vector<1x1x32xf32>
    %208 = vector.shape_cast %207 : vector<1x1x32xf32> to vector<1x32xf32>
    %c1_68 = arith.constant 1 : index
    %c0_69 = arith.constant 0 : index
    %c0_70 = arith.constant 0 : index
    %209 = vector.load %arg7[%c1_68, %c0_69, %c0_70] : memref<2x1x32xf32, #tpu.memory_space<vmem>>, vector<1x1x32xf32>
    %210 = vector.shape_cast %209 : vector<1x1x32xf32> to vector<1x32xf32>
    %211 = arith.addf %146, %206 : vector<16x32xf32>
    %212 = vector.shape_cast %211 : vector<16x32xf32> to vector<2x8x32xf32>
    %cst_71 = arith.constant dense<0.000000e+00> : vector<2x32xf32>
    %213 = vector.multi_reduction <add>, %212, %cst_71 [1] : vector<2x8x32xf32> to vector<2x32xf32>
    %214 = vector.shape_cast %213 : vector<2x32xf32> to vector<2x1x32xf32>
    %cst_72 = arith.constant 8.000000e+00 : f32
    %215 = vector.broadcast %cst_72 : f32 to vector<2x1x32xf32>
    %216 = arith.divf %214, %215 : vector<2x1x32xf32>
    %217 = arith.mulf %212, %212 : vector<2x8x32xf32>
    %cst_73 = arith.constant dense<0.000000e+00> : vector<2x32xf32>
    %218 = vector.multi_reduction <add>, %217, %cst_73 [1] : vector<2x8x32xf32> to vector<2x32xf32>
    %219 = vector.shape_cast %218 : vector<2x32xf32> to vector<2x1x32xf32>
    %cst_74 = arith.constant 8.000000e+00 : f32
    %220 = vector.broadcast %cst_74 : f32 to vector<2x1x32xf32>
    %221 = arith.divf %219, %220 : vector<2x1x32xf32>
    %222 = arith.mulf %216, %216 : vector<2x1x32xf32>
    %223 = arith.subf %221, %222 : vector<2x1x32xf32>
    %224 = vector.broadcast %216 : vector<2x1x32xf32> to vector<2x8x32xf32>
    %225 = arith.subf %212, %224 : vector<2x8x32xf32>
    %cst_75 = arith.constant 9.99999974E-6 : f32
    %226 = vector.broadcast %cst_75 : f32 to vector<2x1x32xf32>
    %227 = arith.addf %223, %226 : vector<2x1x32xf32>
    %228 = math.rsqrt %227 : vector<2x1x32xf32>
    %229 = vector.broadcast %228 : vector<2x1x32xf32> to vector<2x8x32xf32>
    %230 = arith.mulf %225, %229 : vector<2x8x32xf32>
    %231 = vector.shape_cast %208 : vector<1x32xf32> to vector<1x1x32xf32>
    %232 = vector.broadcast %231 : vector<1x1x32xf32> to vector<2x8x32xf32>
    %233 = arith.mulf %230, %232 : vector<2x8x32xf32>
    %234 = vector.shape_cast %210 : vector<1x32xf32> to vector<1x1x32xf32>
    %235 = vector.broadcast %234 : vector<1x1x32xf32> to vector<2x8x32xf32>
    %236 = arith.addf %233, %235 : vector<2x8x32xf32>
    %237 = vector.shape_cast %236 : vector<2x8x32xf32> to vector<16x32xf32>
    %238 = arith.truncf %237 : vector<16x32xf32> to vector<16x32xbf16>
    %c1_76 = arith.constant 1 : index
    %c0_77 = arith.constant 0 : index
    %c0_78 = arith.constant 0 : index
    %239 = vector.load %arg8[%c1_76, %c0_77, %c0_78] : memref<2x32x128xbf16, #tpu.memory_space<vmem>>, vector<1x32x128xbf16>
    %240 = vector.shape_cast %239 : vector<1x32x128xbf16> to vector<32x128xbf16>
    %cst_79 = arith.constant dense<0.000000e+00> : vector<16x128xf32>
    %241 = tpu.matmul %238, %240, %cst_79 {dimension_numbers = #tpu.dot_dimension_numbers<[1], [0], [0], [1], [0, 0, 1, 1], [], []>} : vector<16x32xbf16>, vector<32x128xbf16>, vector<16x128xf32> -> vector<16x128xf32>
    %c1_80 = arith.constant 1 : index
    %c0_81 = arith.constant 0 : index
    %c0_82 = arith.constant 0 : index
    %242 = vector.load %arg9[%c1_80, %c0_81, %c0_82] : memref<2x1x128xf32, #tpu.memory_space<vmem>>, vector<1x1x128xf32>
    %243 = vector.shape_cast %242 : vector<1x1x128xf32> to vector<1x128xf32>
    %244 = vector.broadcast %243 : vector<1x128xf32> to vector<16x128xf32>
    %245 = arith.addf %241, %244 : vector<16x128xf32>
    %cst_83 = arith.constant 0.000000e+00 : f32
    %246 = vector.broadcast %cst_83 : f32 to vector<16x128xf32>
    %247 = arith.maximumf %245, %246 : vector<16x128xf32>
    %248 = arith.truncf %247 : vector<16x128xf32> to vector<16x128xbf16>
    %c1_84 = arith.constant 1 : index
    %c0_85 = arith.constant 0 : index
    %c0_86 = arith.constant 0 : index
    %249 = vector.load %arg10[%c1_84, %c0_85, %c0_86] : memref<2x128x32xbf16, #tpu.memory_space<vmem>>, vector<1x128x32xbf16>
    %250 = vector.shape_cast %249 : vector<1x128x32xbf16> to vector<128x32xbf16>
    %cst_87 = arith.constant dense<0.000000e+00> : vector<16x32xf32>
    %251 = tpu.matmul %248, %250, %cst_87 {dimension_numbers = #tpu.dot_dimension_numbers<[1], [0], [0], [1], [0, 0, 1, 1], [], []>} : vector<16x128xbf16>, vector<128x32xbf16>, vector<16x32xf32> -> vector<16x32xf32>
    %c1_88 = arith.constant 1 : index
    %c0_89 = arith.constant 0 : index
    %c0_90 = arith.constant 0 : index
    %252 = vector.load %arg11[%c1_88, %c0_89, %c0_90] : memref<2x1x32xf32, #tpu.memory_space<vmem>>, vector<1x1x32xf32>
    %253 = vector.shape_cast %252 : vector<1x1x32xf32> to vector<1x32xf32>
    %254 = vector.broadcast %253 : vector<1x32xf32> to vector<16x32xf32>
    %255 = arith.addf %251, %254 : vector<16x32xf32>
    %c1_91 = arith.constant 1 : index
    %c0_92 = arith.constant 0 : index
    %c0_93 = arith.constant 0 : index
    %256 = vector.load %arg12[%c1_91, %c0_92, %c0_93] : memref<2x1x32xf32, #tpu.memory_space<vmem>>, vector<1x1x32xf32>
    %257 = vector.shape_cast %256 : vector<1x1x32xf32> to vector<1x32xf32>
    %c1_94 = arith.constant 1 : index
    %c0_95 = arith.constant 0 : index
    %c0_96 = arith.constant 0 : index
    %258 = vector.load %arg13[%c1_94, %c0_95, %c0_96] : memref<2x1x32xf32, #tpu.memory_space<vmem>>, vector<1x1x32xf32>
    %259 = vector.shape_cast %258 : vector<1x1x32xf32> to vector<1x32xf32>
    %260 = arith.addf %237, %255 : vector<16x32xf32>
    %261 = vector.shape_cast %260 : vector<16x32xf32> to vector<2x8x32xf32>
    %cst_97 = arith.constant dense<0.000000e+00> : vector<2x32xf32>
    %262 = vector.multi_reduction <add>, %261, %cst_97 [1] : vector<2x8x32xf32> to vector<2x32xf32>
    %263 = vector.shape_cast %262 : vector<2x32xf32> to vector<2x1x32xf32>
    %cst_98 = arith.constant 8.000000e+00 : f32
    %264 = vector.broadcast %cst_98 : f32 to vector<2x1x32xf32>
    %265 = arith.divf %263, %264 : vector<2x1x32xf32>
    %266 = arith.mulf %261, %261 : vector<2x8x32xf32>
    %cst_99 = arith.constant dense<0.000000e+00> : vector<2x32xf32>
    %267 = vector.multi_reduction <add>, %266, %cst_99 [1] : vector<2x8x32xf32> to vector<2x32xf32>
    %268 = vector.shape_cast %267 : vector<2x32xf32> to vector<2x1x32xf32>
    %cst_100 = arith.constant 8.000000e+00 : f32
    %269 = vector.broadcast %cst_100 : f32 to vector<2x1x32xf32>
    %270 = arith.divf %268, %269 : vector<2x1x32xf32>
    %271 = arith.mulf %265, %265 : vector<2x1x32xf32>
    %272 = arith.subf %270, %271 : vector<2x1x32xf32>
    %273 = vector.broadcast %265 : vector<2x1x32xf32> to vector<2x8x32xf32>
    %274 = arith.subf %261, %273 : vector<2x8x32xf32>
    %cst_101 = arith.constant 9.99999974E-6 : f32
    %275 = vector.broadcast %cst_101 : f32 to vector<2x1x32xf32>
    %276 = arith.addf %272, %275 : vector<2x1x32xf32>
    %277 = math.rsqrt %276 : vector<2x1x32xf32>
    %278 = vector.broadcast %277 : vector<2x1x32xf32> to vector<2x8x32xf32>
    %279 = arith.mulf %274, %278 : vector<2x8x32xf32>
    %280 = vector.shape_cast %257 : vector<1x32xf32> to vector<1x1x32xf32>
    %281 = vector.broadcast %280 : vector<1x1x32xf32> to vector<2x8x32xf32>
    %282 = arith.mulf %279, %281 : vector<2x8x32xf32>
    %283 = vector.shape_cast %259 : vector<1x32xf32> to vector<1x1x32xf32>
    %284 = vector.broadcast %283 : vector<1x1x32xf32> to vector<2x8x32xf32>
    %285 = arith.addf %282, %284 : vector<2x8x32xf32>
    %286 = vector.shape_cast %285 : vector<2x8x32xf32> to vector<16x32xf32>
    %c0_102 = arith.constant 0 : index
    %c0_103 = arith.constant 0 : index
    %287 = vector.load %arg14[%c0_102, %c0_103] : memref<16x32xf32, #tpu.memory_space<vmem>>, vector<16x32xf32>
    tpu.vector_store %arg14[%c0_102, %c0_103], %286 {strides = array<i32>} : memref<16x32xf32, #tpu.memory_space<vmem>>, vector<16x32xf32>,
    return
  }
  func.func @transform_0(%arg0: i32) -> (i32, i32) {
    %c0_i32 = arith.constant 0 : i32
    %c0_i32_0 = arith.constant 0 : i32
    return %arg0, %c0_i32 : i32, i32
  }
  func.func @transform_1(%arg0: i32) -> (i32, i32) {
    %c0_i32 = arith.constant 0 : i32
    %c0_i32_0 = arith.constant 0 : i32
    %c0_i32_1 = arith.constant 0 : i32
    return %c0_i32, %c0_i32_0 : i32, i32
  }
  func.func @transform_2(%arg0: i32) -> (i32, i32) {
    %c0_i32 = arith.constant 0 : i32
    %c0_i32_0 = arith.constant 0 : i32
    %c0_i32_1 = arith.constant 0 : i32
    return %c0_i32, %c0_i32_0 : i32, i32
  }
  func.func @transform_3(%arg0: i32) -> (i32, i32, i32) {
    %c0_i32 = arith.constant 0 : i32
    %c0_i32_0 = arith.constant 0 : i32
    %c0_i32_1 = arith.constant 0 : i32
    %c0_i32_2 = arith.constant 0 : i32
    return %c0_i32, %c0_i32_0, %c0_i32_1 : i32, i32, i32
  }
  func.func @transform_4(%arg0: i32) -> (i32, i32, i32) {
    %c0_i32 = arith.constant 0 : i32
    %c0_i32_0 = arith.constant 0 : i32
    %c0_i32_1 = arith.constant 0 : i32
    %c0_i32_2 = arith.constant 0 : i32
    return %c0_i32, %c0_i32_0, %c0_i32_1 : i32, i32, i32
  }
  func.func @transform_5(%arg0: i32) -> (i32, i32, i32) {
    %c0_i32 = arith.constant 0 : i32
    %c0_i32_0 = arith.constant 0 : i32
    %c0_i32_1 = arith.constant 0 : i32
    %c0_i32_2 = arith.constant 0 : i32
    return %c0_i32, %c0_i32_0, %c0_i32_1 : i32, i32, i32
  }
  func.func @transform_6(%arg0: i32) -> (i32, i32, i32) {
    %c0_i32 = arith.constant 0 : i32
    %c0_i32_0 = arith.constant 0 : i32
    %c0_i32_1 = arith.constant 0 : i32
    %c0_i32_2 = arith.constant 0 : i32
    return %c0_i32, %c0_i32_0, %c0_i32_1 : i32, i32, i32
  }
  func.func @transform_7(%arg0: i32) -> (i32, i32, i32) {
    %c0_i32 = arith.constant 0 : i32
    %c0_i32_0 = arith.constant 0 : i32
    %c0_i32_1 = arith.constant 0 : i32
    %c0_i32_2 = arith.constant 0 : i32
    return %c0_i32, %c0_i32_0, %c0_i32_1 : i32, i32, i32
  }
  func.func @transform_8(%arg0: i32) -> (i32, i32, i32) {
    %c0_i32 = arith.constant 0 : i32
    %c0_i32_0 = arith.constant 0 : i32
    %c0_i32_1 = arith.constant 0 : i32
    %c0_i32_2 = arith.constant 0 : i32
    return %c0_i32, %c0_i32_0, %c0_i32_1 : i32, i32, i32
  }
  func.func @transform_9(%arg0: i32) -> (i32, i32, i32) {
    %c0_i32 = arith.constant 0 : i32
    %c0_i32_0 = arith.constant 0 : i32
    %c0_i32_1 = arith.constant 0 : i32
    %c0_i32_2 = arith.constant 0 : i32
    return %c0_i32, %c0_i32_0, %c0_i32_1 : i32, i32, i32
  }
  func.func @transform_10(%arg0: i32) -> (i32, i32, i32) {
    %c0_i32 = arith.constant 0 : i32
    %c0_i32_0 = arith.constant 0 : i32
    %c0_i32_1 = arith.constant 0 : i32
    %c0_i32_2 = arith.constant 0 : i32
    return %c0_i32, %c0_i32_0, %c0_i32_1 : i32, i32, i32
  }
  func.func @transform_11(%arg0: i32) -> (i32, i32, i32) {
    %c0_i32 = arith.constant 0 : i32
    %c0_i32_0 = arith.constant 0 : i32
    %c0_i32_1 = arith.constant 0 : i32
    %c0_i32_2 = arith.constant 0 : i32
    return %c0_i32, %c0_i32_0, %c0_i32_1 : i32, i32, i32
  }
  func.func @transform_12(%arg0: i32) -> (i32, i32, i32) {
    %c0_i32 = arith.constant 0 : i32
    %c0_i32_0 = arith.constant 0 : i32
    %c0_i32_1 = arith.constant 0 : i32
    %c0_i32_2 = arith.constant 0 : i32
    return %c0_i32, %c0_i32_0, %c0_i32_1 : i32, i32, i32
  }
  func.func @transform_13(%arg0: i32) -> (i32, i32) {
    %c0_i32 = arith.constant 0 : i32
    %c0_i32_0 = arith.constant 0 : i32
    return %arg0, %c0_i32 : i32, i32
  }
}

</mosaic_0001>

<bundles_post_ra>
// kernel: fwd.1
= control target key start
LH: loop header
LB: loop body
LE: loop exit
PB: predicated region body
PF: predicated region fallthrough
CT: control target
= control target key end

     0   :  { %vm61_vm0 = vcmask 1043456   ;;  %v3481_v2 = vmov 0.0   ;;  %vm3482_vm1 = vmmov 0   ;;  %vm57_vm2 = vcmask 64512   ;;  %s4152_s0 = inlined_call_operand.vmem [shape: f32[16,8], index: 0, kind: input, shape index: {}]   ;;  %s4153_s1 = inlined_call_operand.vmem [shape: bf16[8,32], index: 1, kind: input, shape index: {}]   ;;  %s4154_s2 = inlined_call_operand.vmem [shape: f32[1,32], index: 2, kind: input, shape index: {}]   ;;  %s4155_s3 = inlined_call_operand.vmem [shape: bf16[2,32,192], index: 3, kind: input, shape index: {}]   ;;  %s4156_s4 = inlined_call_operand.vmem [shape: f32[2,1,32], index: 4, kind: input, shape index: {}]   ;;  %s4157_s5 = inlined_call_operand.vmem [shape: f32[2,1,32], index: 5, kind: input, shape index: {}]   ;;  %s4158_s6 = inlined_call_operand.vmem [shape: f32[2,1,32], index: 6, kind: input, shape index: {}]   ;;  %s4159_s7 = inlined_call_operand.vmem [shape: bf16[2,32,128], index: 7, kind: input, shape index: {}]   ;;  %s4160_s8 = inlined_call_operand.vmem [shape: f32[2,1,128], index: 8, kind: input, shape index: {}]   ;;  %s4161_s9 = inlined_call_operand.vmem [shape: bf16[2,128,32], index: 9, kind: input, shape index: {}]   ;;  %s4162_s10 = inlined_call_operand.vmem [shape: f32[2,1,32], index: 10, kind: input, shape index: {}]   ;;  %s4163_s11 = inlined_call_operand.vmem [shape: f32[2,1,32], index: 11, kind: input, shape index: {}]   ;;  %s4164_s12 = inlined_call_operand.vmem [shape: f32[2,1,32], index: 12, kind: input, shape index: {}]   ;;  %s4165_s13 = inlined_call_operand.hbm [shape: f32[16,32], index: 13, kind: output, shape index: {}]  }
   0x1   :  { %v49_v0 = vld [vmem:[%s4153_s1] sm:$0xf]  ;;  %3019 = vmatprep.subr.bf16.mxu0 %v3481_v2  ;;  %3021 = vmatprep.mubr.msk.bf16.mxu0 %vm3482_vm1, %v3481_v2  ;;  %v47_v4 = vld [vmem:[%s4152_s0 + $0x8] sm:$0xff] }
   0x2   :  { %v46_v1 = vld [vmem:[%s4152_s0] sm:$0xff]  ;;  %v63_v3 = vsel %vm61_vm0, %v49_v0, 0  ;;  %3043 = vmatprep.subr.bf16.mxu1 %v3481_v2  ;;  %3045 = vmatprep.mubr.msk.bf16.mxu1 %vm3482_vm1, %v3481_v2 }
   0x3   :  { %3020 = vmatpush3.bf16.msra.mxu0 %v63_v3  ;;  %v48_v5 = vpack.c.bf16 %v47_v4, %v46_v1  ;;  %v3345_v6 = vld [vmem:[%s4155_s3] ss:$8 sps:$4 sm:$0xff]   ;;  %v3347_v7 = vld [vmem:[%s4155_s3 + $0x4] ss:$8 sps:$4 sm:$0xff]  }
   0x4   :  { %135 = vmatprep.subr.bf16.mxu0 %v3347_v7 }
   0x6   :  { %3022 = vmatmul.mubr.msk.bf16.vlgmr.msra.gmra.mrb[0].mxu0 %vm57_vm2, %v48_v5 }
   0x7   :  { %136 = vmatpush1.bf16.msra.mxu0 %v3345_v6 }
   0x8   :  { %18 = vsyncpa [#allocation3], 0  ;;  %v3350_v8 = vld [vmem:[%s4155_s3 + $0x14] ss:$8 sps:$4 sm:$0xff]   ;;  %v3348_v9 = vld [vmem:[%s4155_s3 + $0x10] ss:$8 sps:$4 sm:$0xff]  }
   0x9   :  { %137 = vmatprep.subr.bf16.mxu0 %v3350_v8  ;;  %v3483_v10 = vmov 0   ;;  %v2818_v11 = vld [vmem:[%s4154_s2] ss:$0 sm:$0xff]  ;;  %vm131_vm3 = vcmask 261120   ;;  %s3484_s2 = smov 104   ;;  %s3485_s22 = smov 120  }
   0xa   :  { %167 = vmatprep.mubr.bf16.mxu0 %v3483_v10  ;;  %s3486_s23 = smov 96   ;;  %s3487_s24 = smov 112  }
   0xb   :  { %138 = vmatpush1.bf16.msra.mxu0 %v3348_v9  ;;  %s3488_s25 = smov 64   ;;  %s3489_s26 = smov 32  }
   0xc   :  { %3025 = vmatprep.subr.bf16.mxu0 %v3481_v2  ;;  %s3490_s21 = smov [#allocation2]  }
   0xd   :  { %s2807_s27 = sshll.u32 %s3490_s21, 4  ;;  %s2808_s27 = int_to_ptr.vmem [resolvable:$true] %s2807_s27 }
   0xe   :  { %p3462_p1 = scmp.lt.s32.totalorder %s2808_s27, %s2808_s27 }
  0xd9   :  { %v99_v12 = vpop.f32.mrb[0].mxu0 }
  0xda   :  { %v3023_v13 = vpop.f32.mrb[1].mxu0  ;;  %v3597_v15 = vadd.f32 %v2818_v11, %v99_v12 }
  0xdb   :  { %v102_v14 = vpop.f32.mrb[2].mxu0 }
  0xdc   :  { %v3599_v16 = vadd.f32 %v2818_v11, %v102_v14  ;;  %v3024_v17 = vpop.f32.mrb[3].mxu0 }
  0xde   :  { %v106_v18 = vpack.c.bf16 %v3599_v16, %v3597_v15 }
  0xe0   :  { %2824 = vmatmul.mubr.msk.bf16.vlgmr.msra.gmra.mrb[4].mxu0 %vm131_vm3, %v106_v18 }
  0xe1   :  { %3027 = vmatprep.mubr.msk.bf16.mxu0 %vm3482_vm1, %v3481_v2 }
 0x1b3   :  { %v169_v19 = vpop.f32.mrb[4].mxu0 }
 0x1b4   :  { %v171_v20 = vpop.f32.mrb[5].mxu0  ;;  %v198_v25 = vpack.c.bf16 %v169_v19, %v169_v19 }
 0x1b5   :  { %v173_v21 = vpop.f32.mrb[6].mxu0 }
 0x1b6   :  { %v175_v22 = vpop.f32.mrb[7].mxu0  ;;  %v3295_v23 = vpack.i.bf16 %v173_v21, %v169_v19  ;;  %v3610_v26 = vpack.c.bf16 %v173_v21, %v173_v21 }
 0x1b7   :  { %v3310_v24 = vpack.i.bf16 %v175_v22, %v171_v20 }
 0x1b8   :  { %3296 = vrot.lane.b32.xlu1 %v3295_v23, %s3484_s2  ;;  %3286 = vrot.lane.b32.xlu0 %v3295_v23, %s3485_s22 }
 0x1bc   :  { %233 = vrot.lane.b32.xlu1 %v198_v25, %s3486_s23  ;;  %3291 = vrot.lane.b32.xlu0 %v3295_v23, %s3487_s24 }
 0x1c0   :  { %282 = vrot.lane.b32.xlu0 %v3610_v26, %s3486_s23 }
 0x22a   :  { %v3297_v27 = vpop.permute.xlu1 %3296  ;;  %v3287_v28 = vpop.permute.xlu0 %3286 }
 0x22b   :  { %v3289_v29 = vunpack.i.h.bf16 %v3287_v28  ;;  %v3288_v30 = vunpack.i.l.bf16 %v3287_v28  ;;  %v3298_v38 = vunpack.i.l.bf16 %v3297_v27  ;;  %v3299_v41 = vunpack.i.h.bf16 %v3297_v27 }
 0x22d   :  { %v201_v31 = vpack.c.bf16 %v3289_v29, %v3289_v29  ;;  %v200_v32 = vpack.c.bf16 %v3288_v30, %v3288_v30  ;;  %v204_v43 = vpack.c.bf16 %v3298_v38, %v3298_v38  ;;  %v205_v44 = vpack.c.bf16 %v3299_v41, %v3299_v41 }
 0x22e   :  { %v234_v33 = vpop.permute.xlu1 %233  ;;  %v3292_v34 = vpop.permute.xlu0 %3291 }
 0x22f   :  { %v239_v35 = vsel %vm57_vm2, %v234_v33, 0  ;;  %v3294_v36 = vunpack.i.h.bf16 %v3292_v34  ;;  %v3293_v37 = vunpack.i.l.bf16 %v3292_v34  ;;  %331 = vrot.lane.b32.xlu1 %v200_v32, %s3486_s23  ;;  %380 = vrot.lane.b32.xlu0 %v201_v31, %s3486_s23 }
 0x230   :  { %3026 = vmatpush3.bf16.xpose.msra.mxu0 %v239_v35 }
 0x231   :  { %v203_v39 = vpack.c.bf16 %v3294_v36, %v3294_v36  ;;  %v202_v40 = vpack.c.bf16 %v3293_v37, %v3293_v37  ;;  %3031 = vmatprep.subr.bf16.mxu0 %v3481_v2 }
 0x232   :  { %v283_v42 = vpop.permute.xlu0 %282 }
 0x233   :  { %429 = vrot.lane.b32.xlu1 %v202_v40, %s3486_s23  ;;  %478 = vrot.lane.b32.xlu0 %v203_v39, %s3486_s23  ;;  %v288_v45 = vsel %vm57_vm2, %v283_v42, 0 }
 0x237   :  { %3028 = vmatmul.mubr.msk.bf16.vlgmr.msra.gmra.mrb[8].mxu0 %vm57_vm2, %v198_v25  ;;  %527 = vrot.lane.b32.xlu1 %v204_v43, %s3486_s23 }
 0x238   :  { %576 = vrot.lane.b32.xlu0 %v205_v44, %s3486_s23  ;;  %3032 = vmatpush3.bf16.xpose.msra.mxu0 %v288_v45 }
 0x239   :  { %3033 = vmatprep.mubr.msk.bf16.mxu0 %vm3482_vm1, %v3481_v2  ;;  %3037 = vmatprep.subr.bf16.mxu0 %v3481_v2 }
 0x23b   :  { %3306 = vrot.lane.b32.xlu1 %v3310_v24, %s3488_s25 }
 0x23c   :  { %3301 = vrot.lane.b32.xlu0 %v3295_v23, %s3486_s23 }
 0x23f   :  { %3034 = vmatmul.mubr.msk.bf16.vlgmr.msra.gmra.mrb[12].mxu0 %vm57_vm2, %v3610_v26  ;;  %3311 = vrot.lane.b32.xlu1 %v3310_v24, %s3489_s26 }
 0x240   :  { %3039 = vmatprep.mubr.msk.bf16.mxu0 %vm3482_vm1, %v3481_v2 }
 0x243   :  { %728 = vrot.lane.b32.xlu1 %v198_v25, %s3488_s25 }
 0x2a1   :  { %v332_v46 = vpop.permute.xlu1 %331  ;;  %v381_v47 = vpop.permute.xlu0 %380 }
 0x2a2   :  { %v337_v48 = vsel %vm57_vm2, %v332_v46, 0  ;;  %v386_v49 = vsel %vm57_vm2, %v381_v47, 0 }
 0x2a3   :  { %3038 = vmatpush3.bf16.xpose.msra.mxu0 %v337_v48  ;;  %3044 = vmatpush3.bf16.xpose.msra.mxu1 %v386_v49 }
 0x2a4   :  { %3049 = vmatprep.subr.bf16.mxu0 %v3481_v2  ;;  %3055 = vmatprep.subr.bf16.mxu1 %v3481_v2 }
 0x2a5   :  { %v430_v50 = vpop.permute.xlu1 %429  ;;  %v479_v51 = vpop.permute.xlu0 %478 }
 0x2a6   :  { %v435_v53 = vsel %vm57_vm2, %v430_v50, 0  ;;  %v484_v54 = vsel %vm57_vm2, %v479_v51, 0 }
 0x2a9   :  { %v528_v52 = vpop.permute.xlu1 %527 }
 0x2aa   :  { %3040 = vmatmul.mubr.msk.bf16.vlgmr.msra.gmra.mrb[16].mxu0 %vm57_vm2, %v200_v32  ;;  %3046 = vmatmul.mubr.msk.bf16.vlgmr.msra.gmra.mrb[0].mxu1 %vm57_vm2, %v201_v31  ;;  %v577_v56 = vpop.permute.xlu0 %576  ;;  %v533_v58 = vsel %vm57_vm2, %v528_v52, 0 }
 0x2ab   :  { %3050 = vmatpush3.bf16.xpose.msra.mxu0 %v435_v53  ;;  %3056 = vmatpush3.bf16.xpose.msra.mxu1 %v484_v54  ;;  %v582_v59 = vsel %vm57_vm2, %v577_v56, 0 }
 0x2ac   :  { %3051 = vmatprep.mubr.msk.bf16.mxu0 %vm3482_vm1, %v3481_v2  ;;  %3057 = vmatprep.mubr.msk.bf16.mxu1 %vm3482_vm1, %v3481_v2 }
 0x2ad   :  { %v3647_v55 = vpop.permute.xlu1 %3306  ;;  %3061 = vmatprep.subr.bf16.mxu0 %v3481_v2  ;;  %3067 = vmatprep.subr.bf16.mxu1 %v3481_v2 }
 0x2ae   :  { %v3302_v49 = vpop.permute.xlu0 %3301 }
 0x2af   :  { %v3303_v50 = vunpack.i.l.bf16 %v3302_v49 }
 0x2b1   :  { %v3651_v57 = vpop.permute.xlu1 %3311  ;;  %v226_v51 = vpack.c.bf16 %v3303_v50, %v3303_v50 }
 0x2b2   :  { %3052 = vmatmul.mubr.msk.bf16.vlgmr.msra.gmra.mrb[20].mxu0 %vm57_vm2, %v202_v40  ;;  %3058 = vmatmul.mubr.msk.bf16.vlgmr.msra.gmra.mrb[4].mxu1 %vm57_vm2, %v203_v39 }
 0x2b3   :  { %3062 = vmatpush3.bf16.xpose.msra.mxu0 %v533_v58  ;;  %3068 = vmatpush3.bf16.xpose.msra.mxu1 %v582_v59 }
 0x2b4   :  { %3063 = vmatprep.mubr.msk.bf16.mxu0 %vm3482_vm1, %v3481_v2  ;;  %3069 = vmatprep.mubr.msk.bf16.mxu1 %vm3482_vm1, %v3481_v2 }
 0x2b5   :  { %3073 = vmatprep.subr.bf16.mxu0 %v3481_v2  ;;  %3079 = vmatprep.subr.bf16.mxu1 %v3481_v2  ;;  %v729_v60 = vpop.permute.xlu1 %728 }
 0x2b6   :  { %v734_v61 = vsel %vm61_vm0, %v729_v60, 0 }
 0x2ba   :  { %3064 = vmatmul.mubr.msk.bf16.vlgmr.msra.gmra.mrb[24].mxu0 %vm57_vm2, %v204_v43  ;;  %3070 = vmatmul.mubr.msk.bf16.vlgmr.msra.gmra.mrb[8].mxu1 %vm57_vm2, %v205_v44 }
 0x2bb   :  { %3074 = vmatpush3.bf16.msra.mxu0 %v734_v61  ;;  %3075 = vmatprep.mubr.msk.bf16.mxu0 %vm3482_vm1, %v3481_v2  ;;  %v3304_v61 = vunpack.i.h.bf16 %v3302_v49 }
 0x2bc   :  { %3085 = vmatprep.subr.bf16.mxu0 %v3481_v2  ;;  %3081 = vmatprep.mubr.msk.bf16.mxu1 %vm3482_vm1, %v3481_v2 }
 0x30a   :  { %v275_v62 = vpop.f32.mrb[8].mxu0 }
 0x30b   :  { %v624_v63 = vmul.f32 0.35355338, %v275_v62  ;;  %v3029_v0 = vpop.f32.mrb[9].mxu0  ;;  %v227_v62 = vpack.c.bf16 %v3304_v61, %v3304_v61 }
 0x30c   :  { %v278_v1 = vpop.f32.mrb[10].mxu0 }
 0x30d   :  { %v3030_v3 = vpop.f32.mrb[11].mxu0  ;;  %v632_v4 = vsel %vm57_vm2, %v624_v63, -inf }
 0x30e   :  { %633 = vmax.xlane.f32.xlu1 %v632_v4  ;;  %v3309_v4 = vunpack.i.h.bf16 %v3647_v55 }
 0x312   :  { %v324_v5 = vpop.f32.mrb[12].mxu0 }
 0x313   :  { %v3672_v6 = vmul.f32 0.35355338, %v324_v5  ;;  %v3035_v7 = vpop.f32.mrb[13].mxu0  ;;  %v229_v5 = vpack.c.bf16 %v3309_v4, %v3309_v4 }
 0x314   :  { %v327_v8 = vpop.f32.mrb[14].mxu0 }
 0x315   :  { %v3036_v9 = vpop.f32.mrb[15].mxu0  ;;  %v635_v11 = vsel %vm57_vm2, %v3672_v6, -inf }
 0x316   :  { %636 = vmax.xlane.f32.xlu0 %v635_v11 }
 0x37d   :  { %v373_v12 = vpop.f32.mrb[16].mxu0  ;;  %v422_v13 = vpop.f32.mrb[0].mxu1 }
 0x37e   :  { %v3676_v14 = vmul.f32 0.35355338, %v373_v12  ;;  %v3678_v17 = vmul.f32 0.35355338, %v422_v13  ;;  %v3041_v18 = vpop.f32.mrb[17].mxu0  ;;  %v3047_v19 = vpop.f32.mrb[1].mxu1 }
 0x37f   :  { %v376_v20 = vpop.f32.mrb[18].mxu0  ;;  %v425_v21 = vpop.f32.mrb[2].mxu1 }
 0x380   :  { %v3042_v22 = vpop.f32.mrb[19].mxu0  ;;  %v3048_v23 = vpop.f32.mrb[3].mxu1  ;;  %v641_v24 = vsel %vm57_vm2, %v3678_v17, -inf  ;;  %v638_v25 = vsel %vm57_vm2, %v3676_v14, -inf }
 0x381   :  { %642 = vmax.xlane.f32.xlu1 %v641_v24  ;;  %639 = vmax.xlane.f32.xlu0 %v638_v25 }
 0x385   :  { %v471_v27 = vpop.f32.mrb[20].mxu0  ;;  %v520_v28 = vpop.f32.mrb[4].mxu1 }
 0x386   :  { %v628_v29 = vmul.f32 0.35355338, %v471_v27  ;;  %v3684_v30 = vmul.f32 0.35355338, %v520_v28  ;;  %v3053_v31 = vpop.f32.mrb[21].mxu0  ;;  %v3059_v32 = vpop.f32.mrb[5].mxu1 }
 0x387   :  { %v474_v33 = vpop.f32.mrb[22].mxu0  ;;  %v523_v34 = vpop.f32.mrb[6].mxu1 }
 0x388   :  { %v3054_v35 = vpop.f32.mrb[23].mxu0  ;;  %v3060_v36 = vpop.f32.mrb[7].mxu1  ;;  %v647_v37 = vsel %vm57_vm2, %v3684_v30, -inf  ;;  %v644_v38 = vsel %vm57_vm2, %v628_v29, -inf  ;;  %v3308_v33 = vunpack.i.l.bf16 %v3647_v55 }
 0x389   :  { %648 = vmax.xlane.f32.xlu1 %v647_v37  ;;  %645 = vmax.xlane.f32.xlu0 %v644_v38  ;;  %v3314_v35 = vunpack.i.h.bf16 %v3651_v57 }
 0x38a   :  { %v228_v34 = vpack.c.bf16 %v3308_v33, %v3308_v33 }
 0x38b   :  { %v231_v36 = vpack.c.bf16 %v3314_v35, %v3314_v35 }
 0x38d   :  { %v569_v39 = vpop.f32.mrb[24].mxu0  ;;  %v618_v40 = vpop.f32.mrb[8].mxu1 }
 0x38e   :  { %v630_v41 = vmul.f32 0.35355338, %v569_v39  ;;  %v3065_v42 = vpop.f32.mrb[25].mxu0  ;;  %v3071_v43 = vpop.f32.mrb[9].mxu1  ;;  %v3693_v56 = vmul.f32 0.35355338, %v618_v40 }
 0x38f   :  { %v572_v44 = vpop.f32.mrb[26].mxu0  ;;  %v621_v45 = vpop.f32.mrb[10].mxu1 }
 0x390   :  { %v3066_v46 = vpop.f32.mrb[27].mxu0  ;;  %v3072_v47 = vpop.f32.mrb[11].mxu1  ;;  %v650_v48 = vsel %vm57_vm2, %v630_v41, -inf  ;;  %v653_v58 = vsel %vm57_vm2, %v3693_v56, -inf }
 0x391   :  { %651 = vmax.xlane.f32.xlu0 %v650_v48 }
 0x39a   :  { %825 = vrot.lane.b32.xlu1 %v226_v51, %s3488_s25  ;;  %v3313_v51 = vunpack.i.l.bf16 %v3651_v57 }
 0x39b   :  { %v634_v52 = vpop.xlane.xlu1 %633 }
 0x39c   :  { %v656_v53 = vsub.f32 %v624_v63, %v634_v52  ;;  %v230_v52 = vpack.c.bf16 %v3313_v51, %v3313_v51 }
 0x39e   :  { %v664_v54 = vmul.f32 1.442695, %v656_v53 }
 0x3a0   :  { %3377 = vpow2.f32 %v664_v54 }
 0x3a7   :  { %776 = vrot.lane.b32.xlu0 %v3610_v26, %s3488_s25  ;;  %v637_v26 = vpop.xlane.xlu0 %636 }
 0x3a8   :  { %v657_v63 = vsub.f32 %v3672_v6, %v637_v26 }
 0x3aa   :  { %v3697_v59 = vpop.eup %3377  ;;  %v666_v0 = vmul.f32 1.442695, %v657_v63 }
 0x3ab   :  { %v680_v60 = vsel %vm57_vm2, %v3697_v59, 0.0 }
 0x3ac   :  { %3379 = vpow2.f32 %v666_v0 }
 0x3b6   :  { %v3703_v1 = vpop.eup %3379 }
 0x3b7   :  { %v683_v3 = vsel %vm57_vm2, %v3703_v1, 0.0 }
 0x3be   :  { %654 = vmax.xlane.f32.xlu1 %v653_v58 }
 0x3c6   :  { %681 = vadd.xlane.f32.xlu0 %v680_v60 }
 0x3cf   :  { %874 = vrot.lane.b32.xlu1 %v227_v62, %s3488_s25 }
 0x3f3   :  { %684 = vadd.xlane.f32.xlu1 %v683_v3 }
 0x404   :  { %972 = vrot.lane.b32.xlu1 %v229_v5, %s3488_s25 }
 0x40e   :  { %v643_v7 = vpop.xlane.xlu1 %642  ;;  %v640_v8 = vpop.xlane.xlu0 %639 }
 0x40f   :  { %v659_v9 = vsub.f32 %v3678_v17, %v643_v7  ;;  %v658_v11 = vsub.f32 %v3676_v14, %v640_v8 }
 0x411   :  { %v668_v6 = vmul.f32 1.442695, %v658_v11  ;;  %v670_v12 = vmul.f32 1.442695, %v659_v9 }
 0x413   :  { %3381 = vpow2.f32 %v668_v6 }
 0x414   :  { %3383 = vpow2.f32 %v670_v12 }
 0x416   :  { %v646_v13 = vpop.xlane.xlu0 %645  ;;  %v649_v37 = vpop.xlane.xlu1 %648 }
 0x417   :  { %v660_v18 = vsub.f32 %v628_v29, %v646_v13  ;;  %v661_v38 = vsub.f32 %v3684_v30, %v649_v37 }
 0x419   :  { %v672_v19 = vmul.f32 1.442695, %v660_v18  ;;  %v674_v39 = vmul.f32 1.442695, %v661_v38 }
 0x41a   :  { %v826_v40 = vpop.permute.xlu1 %825 }
 0x41b   :  { %3385 = vpow2.f32 %v672_v19  ;;  %v831_v50 = vsel %vm61_vm0, %v826_v40, 0 }
 0x41d   :  { %v3711_v20 = vpop.eup %3381 }
 0x41e   :  { %v652_v21 = vpop.xlane.xlu0 %651  ;;  %v686_v23 = vsel %vm57_vm2, %v3711_v20, 0.0  ;;  %v3715_v24 = vpop.eup %3383 }
 0x41f   :  { %v662_v22 = vsub.f32 %v630_v41, %v652_v21  ;;  %687 = vadd.xlane.f32.xlu0 %v686_v23  ;;  %v689_v27 = vsel %vm57_vm2, %v3715_v24, 0.0 }
 0x421   :  { %v676_v17 = vmul.f32 1.442695, %v662_v22 }
 0x422   :  { %v777_v14 = vpop.permute.xlu0 %776 }
 0x423   :  { %3387 = vpow2.f32 %v676_v17  ;;  %v782_v25 = vsel %vm61_vm0, %v777_v14, 0  ;;  %690 = vadd.xlane.f32.xlu0 %v689_v27 }
 0x424   :  { %3080 = vmatpush3.bf16.msra.mxu1 %v782_v25  ;;  %3389 = vpow2.f32 %v674_v39 }
 0x425   :  { %3091 = vmatprep.subr.bf16.mxu1 %v3481_v2  ;;  %v3721_v28 = vpop.eup %3385 }
 0x426   :  { %v692_v29 = vsel %vm57_vm2, %v3721_v28, 0.0 }
 0x428   :  { %693 = vadd.xlane.f32.xlu1 %v692_v29 }
 0x42d   :  { %v3725_v31 = vpop.eup %3387 }
 0x42e   :  { %v698_v32 = vsel %vm57_vm2, %v3725_v31, 0.0  ;;  %v3735_v44 = vpop.eup %3389 }
 0x42f   :  { %699 = vadd.xlane.f32.xlu1 %v698_v32  ;;  %v695_v45 = vsel %vm57_vm2, %v3735_v44, 0.0 }
 0x439   :  { %923 = vrot.lane.b32.xlu0 %v228_v34, %s3488_s25 }
 0x440   :  { %1070 = vrot.lane.b32.xlu1 %v231_v36, %s3488_s25 }
 0x44b   :  { %v655_v41 = vpop.xlane.xlu1 %654 }
 0x44c   :  { %v663_v42 = vsub.f32 %v3693_v56, %v655_v41  ;;  %v3351_v41 = vld [vmem:[%s4159_s7] sm:$0xff]  }
 0x44e   :  { %v678_v43 = vmul.f32 1.442695, %v663_v42  ;;  %v3352_v42 = vld [vmem:[%s4159_s7 + $0x8] sm:$0xff]  }
 0x44f   :  { %v875_v53 = vpop.permute.xlu1 %874 }
 0x450   :  { %3391 = vpow2.f32 %v678_v43  ;;  %v880_v60 = vsel %vm61_vm0, %v875_v53, 0  ;;  %v3353_v43 = vld [vmem:[%s4161_s9] sm:$0xff]  }
 0x453   :  { %v682_v55 = vpop.xlane.xlu0 %681 }
 0x454   :  { %3393 = vrcp.f32 %v682_v55  ;;  %v3354_v55 = vld [vmem:[%s4161_s9 + $0x8] sm:$0xff]  }
 0x458   :  { %696 = vadd.xlane.f32.xlu0 %v695_v45  ;;  %v3356_v45 = vld [vmem:[%s4161_s9 + $0x18] sm:$0xff]  }
 0x45a   :  { %v3739_v46 = vpop.eup %3391 }
 0x45b   :  { %v701_v30 = vsel %vm57_vm2, %v3739_v46, 0.0 }
 0x45c   :  { %702 = vadd.xlane.f32.xlu0 %v701_v30 }
 0x45e   :  { %v3394_v47 = vpop.eup %3393 }
 0x45f   :  { %v705_v48 = vmul.f32 %v3394_v47, %v3697_v59 }
 0x461   :  { %v720_v49 = vpack.c.bf16 %v705_v48, %v705_v48 }
 0x463   :  { %3076 = vmatmul.mubr.msk.bf16.vlgmr.msra.gmra.mrb[28].mxu0 %vm57_vm2, %v720_v49 }
 0x464   :  { %3086 = vmatpush3.bf16.msra.mxu0 %v831_v50  ;;  %3087 = vmatprep.mubr.msk.bf16.mxu0 %vm3482_vm1, %v3481_v2  ;;  %v3358_v50 = vld [vmem:[%s4161_s9 + $0x28] sm:$0xff]  }
 0x465   :  { %3097 = vmatprep.subr.bf16.mxu0 %v3481_v2 }
 0x472   :  { %1021 = vrot.lane.b32.xlu0 %v230_v52, %s3488_s25 }
 0x480   :  { %v685_v54 = vpop.xlane.xlu1 %684 }
 0x481   :  { %3395 = vrcp.f32 %v685_v54 }
 0x484   :  { %v973_v61 = vpop.permute.xlu1 %972 }
 0x485   :  { %v978_v11 = vsel %vm61_vm0, %v973_v61, 0 }
 0x48b   :  { %v3396_v56 = vpop.eup %3395 }
 0x48c   :  { %v707_v58 = vmul.f32 %v3396_v56, %v3703_v1 }
 0x48e   :  { %v721_v59 = vpack.c.bf16 %v707_v58, %v707_v58 }
 0x490   :  { %3082 = vmatmul.mubr.msk.bf16.vlgmr.msra.gmra.mrb[12].mxu1 %vm57_vm2, %v721_v59 }
 0x491   :  { %3092 = vmatpush3.bf16.msra.mxu1 %v880_v60  ;;  %3093 = vmatprep.mubr.msk.bf16.mxu1 %vm3482_vm1, %v3481_v2 }
 0x492   :  { %3103 = vmatprep.subr.bf16.mxu1 %v3481_v2 }
 0x4ac   :  { %v688_v57 = vpop.xlane.xlu0 %687 }
 0x4ad   :  { %3397 = vrcp.f32 %v688_v57 }
 0x4b0   :  { %v691_v62 = vpop.xlane.xlu0 %690 }
 0x4b1   :  { %3399 = vrcp.f32 %v691_v62 }
 0x4b4   :  { %v924_v1 = vpop.permute.xlu0 %923 }
 0x4b5   :  { %v694_v26 = vpop.xlane.xlu1 %693  ;;  %v929_v7 = vsel %vm61_vm0, %v924_v1, 0 }
 0x4b6   :  { %3401 = vrcp.f32 %v694_v26 }
 0x4b7   :  { %v3398_v63 = vpop.eup %3397 }
 0x4b8   :  { %v709_v0 = vmul.f32 %v3398_v63, %v3711_v20  ;;  %v2841_v63 = vld [vmem:[%s4156_s4] ss:$0 sm:$0xff] }
 0x4ba   :  { %v722_v3 = vpack.c.bf16 %v709_v0, %v709_v0 }
 0x4bb   :  { %v3400_v4 = vpop.eup %3399 }
 0x4bc   :  { %v711_v5 = vmul.f32 %v3400_v4, %v3715_v24  ;;  %3088 = vmatmul.mubr.msk.bf16.vlgmr.msra.gmra.mrb[32].mxu0 %vm57_vm2, %v722_v3  ;;  %v700_v13 = vpop.xlane.xlu1 %699 }
 0x4bd   :  { %3098 = vmatpush3.bf16.msra.mxu0 %v929_v7  ;;  %3099 = vmatprep.mubr.msk.bf16.mxu0 %vm3482_vm1, %v3481_v2  ;;  %3403 = vrcp.f32 %v700_v13 }
 0x4be   :  { %v723_v8 = vpack.c.bf16 %v711_v5, %v711_v5  ;;  %3109 = vmatprep.subr.bf16.mxu0 %v3481_v2 }
 0x4c0   :  { %v3402_v9 = vpop.eup %3401  ;;  %3094 = vmatmul.mubr.msk.bf16.vlgmr.msra.gmra.mrb[16].mxu1 %vm57_vm2, %v723_v8  ;;  %v1071_v25 = vpop.permute.xlu1 %1070 }
 0x4c1   :  { %v713_v6 = vmul.f32 %v3402_v9, %v3721_v28  ;;  %3104 = vmatpush3.bf16.msra.mxu1 %v978_v11  ;;  %3105 = vmatprep.mubr.msk.bf16.mxu1 %vm3482_vm1, %v3481_v2  ;;  %v1076_v29 = vsel %vm61_vm0, %v1071_v25, 0 }
 0x4c2   :  { %3115 = vmatprep.subr.bf16.mxu1 %v3481_v2 }
 0x4c3   :  { %v724_v12 = vpack.c.bf16 %v713_v6, %v713_v6 }
 0x4c5   :  { %3100 = vmatmul.mubr.msk.bf16.vlgmr.msra.gmra.mrb[36].mxu0 %vm57_vm2, %v724_v12 }
 0x4c6   :  { %3111 = vmatprep.mubr.msk.bf16.mxu0 %vm3482_vm1, %v3481_v2 }
 0x4c7   :  { %v3404_v19 = vpop.eup %3403 }
 0x4c8   :  { %v717_v21 = vmul.f32 %v3404_v19, %v3725_v31 }
 0x4ca   :  { %v726_v17 = vpack.c.bf16 %v717_v21, %v717_v21 }
 0x4e5   :  { %v697_v18 = vpop.xlane.xlu0 %696 }
 0x4e6   :  { %3405 = vrcp.f32 %v697_v18 }
 0x4e9   :  { %v703_v20 = vpop.xlane.xlu0 %702 }
 0x4ea   :  { %3407 = vrcp.f32 %v703_v20 }
 0x4ed   :  { %v1022_v22 = vpop.permute.xlu0 %1021 }
 0x4ee   :  { %v1027_v23 = vsel %vm61_vm0, %v1022_v22, 0 }
 0x4ef   :  { %3110 = vmatpush3.bf16.msra.mxu0 %v1027_v23 }
 0x4f0   :  { %v3406_v24 = vpop.eup %3405  ;;  %3121 = vmatprep.subr.bf16.mxu0 %v3481_v2 }
 0x4f1   :  { %v715_v14 = vmul.f32 %v3406_v24, %v3735_v44  ;;  %v3355_v44 = vld [vmem:[%s4161_s9 + $0x10] sm:$0xff]  }
 0x4f2   :  { %3112 = vmatmul.mubr.msk.bf16.vlgmr.msra.gmra.mrb[40].mxu0 %vm57_vm2, %v726_v17 }
 0x4f3   :  { %v725_v27 = vpack.c.bf16 %v715_v14, %v715_v14  ;;  %3125 = vmatprep.mubr.msk.bf16.mxu0 %vm3482_vm1, %v3481_v2  ;;  %3122 = vmatpush3.bf16.msra.mxu0 %v3351_v41 }
 0x4f4   :  { %v3408_v28 = vpop.eup %3407  ;;  %3123 = vmatprep.subr.bf16.mxu0 %v3481_v2 }
 0x4f5   :  { %3106 = vmatmul.mubr.msk.bf16.vlgmr.msra.gmra.mrb[20].mxu1 %vm57_vm2, %v725_v27  ;;  %v719_v31 = vmul.f32 %v3408_v28, %v3739_v46  ;;  %v3357_v46 = vld [vmem:[%s4161_s9 + $0x20] sm:$0xff]  }
 0x4f6   :  { %3116 = vmatpush3.bf16.msra.mxu1 %v1076_v29  ;;  %3117 = vmatprep.mubr.msk.bf16.mxu1 %vm3482_vm1, %v3481_v2 }
 0x4f7   :  { %3129 = vmatprep.subr.bf16.mxu1 %v3481_v2  ;;  %v727_v32 = vpack.c.bf16 %v719_v31, %v719_v31  ;;  %3124 = vmatpush3.bf16.msra.mxu0 %v3352_v42 }
 0x4fd   :  { %3118 = vmatmul.mubr.msk.bf16.vlgmr.msra.gmra.mrb[24].mxu1 %vm57_vm2, %v727_v32 }
 0x4fe   :  { %3145 = vmatprep.mubr.msk.bf16.mxu1 %vm3482_vm1, %v3481_v2  ;;  %3130 = vmatpush3.bf16.msra.mxu1 %v3353_v43 }
 0x4ff   :  { %3131 = vmatprep.subr.bf16.mxu1 %v3481_v2 }
 0x502   :  { %3132 = vmatpush3.bf16.msra.mxu1 %v3354_v55 }
 0x503   :  { %3133 = vmatprep.subr.bf16.mxu1 %v3481_v2 }
 0x506   :  { %3134 = vmatpush3.bf16.msra.mxu1 %v3355_v44 }
 0x507   :  { %3135 = vmatprep.subr.bf16.mxu1 %v3481_v2 }
 0x50a   :  { %3136 = vmatpush3.bf16.msra.mxu1 %v3356_v45 }
 0x50b   :  { %3137 = vmatprep.subr.bf16.mxu1 %v3481_v2 }
 0x50e   :  { %3138 = vmatpush3.bf16.msra.mxu1 %v3357_v46 }
 0x50f   :  { %3139 = vmatprep.subr.bf16.mxu1 %v3481_v2 }
 0x512   :  { %3140 = vmatpush3.bf16.msra.mxu1 %v3358_v50 }
 0x513   :  { %3141 = vmatprep.subr.bf16.mxu1 %v3481_v2 }
 0x536   :  { %v770_v33 = vpop.f32.mrb[28].mxu0 }
 0x537   :  { %v3077_v34 = vpop.f32.mrb[29].mxu0 }
 0x538   :  { %v773_v35 = vpop.f32.mrb[30].mxu0 }
 0x539   :  { %v3078_v36 = vpop.f32.mrb[31].mxu0 }
 0x563   :  { %v818_v37 = vpop.f32.mrb[12].mxu1 }
 0x564   :  { %v3083_v38 = vpop.f32.mrb[13].mxu1 }
 0x565   :  { %v821_v39 = vpop.f32.mrb[14].mxu1 }
 0x566   :  { %v3084_v40 = vpop.f32.mrb[15].mxu1 }
 0x58f   :  { %v867_v30 = vpop.f32.mrb[32].mxu0 }
 0x590   :  { %v1118_v47 = vadd.f32 %v867_v30, %v770_v33  ;;  %v3089_v48 = vpop.f32.mrb[33].mxu0 }
 0x591   :  { %v870_v49 = vpop.f32.mrb[34].mxu0 }
 0x592   :  { %v3090_v51 = vpop.f32.mrb[35].mxu0 }
 0x593   :  { %v916_v52 = vpop.f32.mrb[16].mxu1 }
 0x594   :  { %v1119_v53 = vadd.f32 %v916_v52, %v818_v37  ;;  %v3095_v54 = vpop.f32.mrb[17].mxu1 }
 0x595   :  { %v919_v56 = vpop.f32.mrb[18].mxu1 }
 0x596   :  { %v3096_v58 = vpop.f32.mrb[19].mxu1 }
 0x598   :  { %v965_v59 = vpop.f32.mrb[36].mxu0 }
 0x599   :  { %v1120_v60 = vadd.f32 %v1118_v47, %v965_v59  ;;  %v3101_v57 = vpop.f32.mrb[37].mxu0 }
 0x59a   :  { %v968_v61 = vpop.f32.mrb[38].mxu0 }
 0x59b   :  { %v3102_v62 = vpop.f32.mrb[39].mxu0 }
 0x5c5   :  { %v1063_v26 = vpop.f32.mrb[40].mxu0 }
 0x5c6   :  { %v1122_v0 = vadd.f32 %v1120_v60, %v1063_v26  ;;  %v3113_v1 = vpop.f32.mrb[41].mxu0 }
 0x5c7   :  { %v1066_v3 = vpop.f32.mrb[42].mxu0 }
 0x5c8   :  { %v1131_v4 = vadd.f32 %v2841_v63, %v1122_v0  ;;  %v1014_v5 = vpop.f32.mrb[20].mxu1  ;;  %v3114_v7 = vpop.f32.mrb[43].mxu0 }
 0x5c9   :  { %v1121_v8 = vadd.f32 %v1119_v53, %v1014_v5  ;;  %v3107_v9 = vpop.f32.mrb[21].mxu1  ;;  %v2843_v5 = vld [vmem:[%s4158_s6] ss:$0 sm:$0xff] }
 0x5ca   :  { %v1135_v11 = vadd.f32 %v1131_v4, %v3597_v15  ;;  %v1017_v6 = vpop.f32.mrb[22].mxu1 }
 0x5cb   :  { %v3108_v12 = vpop.f32.mrb[23].mxu1 }
 0x5cc   :  { %v1137_v13 = vsel %vm131_vm3, %v1135_v11, 0.0  ;;  %v1154_v18 = vmul.f32 %v1135_v11, %v1135_v11  ;;  %v3360_v12 = vld [vmem:[%s4161_s9 + $0x38] sm:$0xff]  }
 0x5cd   :  { %v1138_v19 = vrot.slane %v1137_v13, 4 }
 0x5ce   :  { %v1156_v20 = vsel %vm131_vm3, %v1154_v18, 0.0 }
 0x5cf   :  { %v1139_v21 = vadd.f32 %v1138_v19, %v1137_v13  ;;  %v1157_v22 = vrot.slane %v1156_v20, 4  ;;  %v2844_v13 = vld [vmem:[%s4160_s8] ss:$0 sm:$0xff] }
 0x5d0   :  { %v1112_v23 = vpop.f32.mrb[24].mxu1 }
 0x5d1   :  { %v1140_v24 = vrot.slane %v1139_v21, 2  ;;  %v1158_v17 = vadd.f32 %v1157_v22, %v1156_v20  ;;  %v1123_v14 = vadd.f32 %v1121_v8, %v1112_v23  ;;  %v3119_v25 = vpop.f32.mrb[25].mxu1 }
 0x5d2   :  { %v1115_v27 = vpop.f32.mrb[26].mxu1  ;;  %v3361_v25 = vld [vmem:[%s4155_s3 + $0x20] ss:$8 sps:$4 sm:$0xff]  }
 0x5d3   :  { %v1141_v28 = vadd.f32 %v1140_v24, %v1139_v21  ;;  %v1159_v29 = vrot.slane %v1158_v17, 2  ;;  %v1132_v31 = vadd.f32 %v2841_v63, %v1123_v14  ;;  %v3120_v15 = vpop.f32.mrb[27].mxu1  ;;  %v2842_v63 = vld [vmem:[%s4157_s5] ss:$0 sm:$0xff]  ;;  %v3363_v14 = vld [vmem:[%s4155_s3 + $0x24] ss:$8 sps:$4 sm:$0xff]  }
 0x5d4   :  { %1478 = vmatprep.subr.bf16.mxu0 %v3363_v14  ;;  %v3366_v27 = vld [vmem:[%s4155_s3 + $0x34] ss:$8 sps:$4 sm:$0xff]  }
 0x5d5   :  { %v1142_v32 = vrot.slane %v1141_v28, 1  ;;  %v1160_v33 = vadd.f32 %v1159_v29, %v1158_v17  ;;  %v1136_v34 = vadd.f32 %v1132_v31, %v3599_v16  ;;  %v2848_v29 = vld [vmem:[%s4162_s10] ss:$0 sm:$0xff] }
 0x5d7   :  { %v1143_v35 = vadd.f32 %v1142_v32, %v1141_v28  ;;  %v1161_v36 = vrot.slane %v1160_v33, 1  ;;  %v1144_v37 = vsel %vm131_vm3, %v1136_v34, 0.0  ;;  %v1155_v38 = vmul.f32 %v1136_v34, %v1136_v34  ;;  %v3364_v28 = vld [vmem:[%s4155_s3 + $0x30] ss:$8 sps:$4 sm:$0xff]  }
 0x5d8   :  { %v1145_v39 = vrot.slane %v1144_v37, 4 }
 0x5d9   :  { %v1152_v40 = vmul.f32 0.125, %v1143_v35  ;;  %v1162_v41 = vadd.f32 %v1161_v36, %v1160_v33  ;;  %v1163_v42 = vsel %vm131_vm3, %v1155_v38, 0.0 }
 0x5da   :  { %v1146_v43 = vadd.f32 %v1145_v39, %v1144_v37  ;;  %v1164_v55 = vrot.slane %v1163_v42, 4 }
 0x5db   :  { %v1170_v44 = vmul.f32 0.125, %v1162_v41  ;;  %v1172_v45 = vmul.f32 %v1152_v40, %v1152_v40  ;;  %v1176_v62 = vsub.f32 %v1135_v11, %v1152_v40  ;;  %v3359_v11 = vld [vmem:[%s4161_s9 + $0x30] sm:$0xff]  }
 0x5dc   :  { %v1147_v46 = vrot.slane %v1146_v43, 2  ;;  %v1165_v30 = vadd.f32 %v1164_v55, %v1163_v42  ;;  %3142 = vmatpush3.bf16.msra.mxu1 %v3359_v11 }
 0x5dd   :  { %v1174_v47 = vsub.f32 %v1170_v44, %v1172_v45  ;;  %3143 = vmatprep.subr.bf16.mxu1 %v3481_v2 }
 0x5de   :  { %v1148_v48 = vadd.f32 %v1147_v46, %v1146_v43  ;;  %v1166_v49 = vrot.slane %v1165_v30, 2 }
 0x5df   :  { %v1178_v51 = vadd.f32 1e-05, %v1174_v47 }
 0x5e0   :  { %v1149_v16 = vrot.slane %v1148_v48, 1  ;;  %v1167_v50 = vadd.f32 %v1166_v49, %v1165_v30  ;;  %3144 = vmatpush3.bf16.msra.mxu1 %v3360_v12 }
 0x5e1   :  { %3409 = vrsqrt.f32 %v1178_v51  ;;  %3167 = vmatprep.subr.bf16.mxu1 %v3481_v2 }
 0x5e2   :  { %v1150_v52 = vadd.f32 %v1149_v16, %v1148_v48  ;;  %v1168_v53 = vrot.slane %v1167_v50, 1 }
 0x5e4   :  { %v1153_v54 = vmul.f32 0.125, %v1150_v52  ;;  %v1169_v56 = vadd.f32 %v1168_v53, %v1167_v50 }
 0x5e6   :  { %v1171_v58 = vmul.f32 0.125, %v1169_v56  ;;  %v1173_v59 = vmul.f32 %v1153_v54, %v1153_v54  ;;  %v1177_v0 = vsub.f32 %v1136_v34, %v1153_v54 }
 0x5e8   :  { %v1175_v60 = vsub.f32 %v1171_v58, %v1173_v59 }
 0x5ea   :  { %v1179_v57 = vadd.f32 1e-05, %v1175_v60 }
 0x5eb   :  { %v3410_v61 = vpop.eup %3409 }
 0x5ec   :  { %3411 = vrsqrt.f32 %v1179_v57  ;;  %v1182_v26 = vmul.f32 %v3410_v61, %v1176_v62 }
 0x5ee   :  { %v1190_v3 = vmul.f32 %v2842_v63, %v1182_v26 }
 0x5f0   :  { %v1198_v8 = vadd.f32 %v2843_v5, %v1190_v3 }
 0x5f6   :  { %v3412_v1 = vpop.eup %3411 }
 0x5f7   :  { %v1183_v4 = vmul.f32 %v3412_v1, %v1177_v0 }
 0x5f9   :  { %v1191_v7 = vmul.f32 %v2842_v63, %v1183_v4 }
 0x5fb   :  { %v1199_v9 = vadd.f32 %v2843_v5, %v1191_v7 }
 0x5fd   :  { %v1200_v6 = vpack.c.bf16 %v1199_v9, %v1198_v8 }
 0x5ff   :  { %3126 = vmatmul.mubr.msk.bf16.vlgmr.msra.gmra.mrb[44].mxu0 %vm131_vm3, %v1200_v6 }
 0x600   :  { %1510 = vmatprep.mubr.bf16.mxu0 %v3483_v10  ;;  %1479 = vmatpush1.bf16.msra.mxu0 %v3361_v25 }
 0x601   :  { %1480 = vmatprep.subr.bf16.mxu0 %v3366_v27 }
 0x604   :  { %1481 = vmatpush1.bf16.msra.mxu0 %v3364_v28 }
 0x605   :  { %3149 = vmatprep.subr.bf16.mxu0 %v3481_v2 }
 0x6d2   :  { %v1261_v18 = vpop.f32.mrb[44].mxu0 }
 0x6d3   :  { %v1262_v10 = vadd.f32 %v2844_v13, %v1261_v18  ;;  %v3127_v19 = vpop.f32.mrb[45].mxu0 }
 0x6d4   :  { %v1264_v20 = vpop.f32.mrb[46].mxu0 }
 0x6d5   :  { %v1265_v21 = vadd.f32 %v2844_v13, %v1264_v20  ;;  %v3128_v22 = vpop.f32.mrb[47].mxu0  ;;  %v1268_v23 = vmax.f32 %v1262_v10, 0.0  ;;  %v2857_v10 = vld [vmem:[%s4163_s11] ss:$0 sm:$0xff] }
 0x6d7   :  { %v1269_v24 = vmax.f32 %v1265_v21, 0.0 }
 0x6d9   :  { %v1270_v17 = vpack.c.bf16 %v1269_v24, %v1268_v23  ;;  %v2858_v24 = vld [vmem:[%s4164_s12] ss:$0 sm:$0xff] }
 0x6db   :  { %3146 = vmatmul.mubr.bf16.vlgmr.msra.gmra.mrb[28].mxu1 %v1270_v17 }
 0x6dc   :  { %3169 = vmatprep.mubr.msk.bf16.mxu1 %vm3482_vm1, %v3481_v2 }
 0x7ae   :  { %v1376_v31 = vpop.f32.mrb[28].mxu1 }
 0x7af   :  { %v1377_v15 = vadd.f32 %v2848_v29, %v1376_v31  ;;  %v3147_v32 = vpop.f32.mrb[29].mxu1 }
 0x7b0   :  { %v1379_v33 = vpop.f32.mrb[30].mxu1 }
 0x7b1   :  { %v1385_v34 = vadd.f32 %v1377_v15, %v1198_v8  ;;  %v1380_v35 = vadd.f32 %v2848_v29, %v1379_v33  ;;  %v3148_v36 = vpop.f32.mrb[31].mxu1 }
 0x7b3   :  { %v1387_v37 = vsel %vm131_vm3, %v1385_v34, 0.0  ;;  %v1403_v38 = vmul.f32 %v1385_v34, %v1385_v34  ;;  %v1386_v39 = vadd.f32 %v1380_v35, %v1199_v9 }
 0x7b4   :  { %v1388_v40 = vrot.slane %v1387_v37, 4 }
 0x7b5   :  { %v1405_v41 = vsel %vm131_vm3, %v1403_v38, 0.0  ;;  %v1394_v42 = vsel %vm131_vm3, %v1386_v39, 0.0  ;;  %v1404_v43 = vmul.f32 %v1386_v39, %v1386_v39 }
 0x7b6   :  { %v1389_v55 = vadd.f32 %v1388_v40, %v1387_v37  ;;  %v1406_v44 = vrot.slane %v1405_v41, 4  ;;  %v1395_v45 = vrot.slane %v1394_v42, 4 }
 0x7b7   :  { %v1412_v46 = vsel %vm131_vm3, %v1404_v43, 0.0 }
 0x7b8   :  { %v1390_v30 = vrot.slane %v1389_v55, 2  ;;  %v1407_v47 = vadd.f32 %v1406_v44, %v1405_v41  ;;  %v1396_v48 = vadd.f32 %v1395_v45, %v1394_v42  ;;  %v1413_v49 = vrot.slane %v1412_v46, 4 }
 0x7ba   :  { %v1391_v16 = vadd.f32 %v1390_v30, %v1389_v55  ;;  %v1408_v50 = vrot.slane %v1407_v47, 2  ;;  %v1397_v51 = vrot.slane %v1396_v48, 2  ;;  %v1414_v52 = vadd.f32 %v1413_v49, %v1412_v46 }
 0x7bc   :  { %v1392_v53 = vrot.slane %v1391_v16, 1  ;;  %v1409_v54 = vadd.f32 %v1408_v50, %v1407_v47  ;;  %v1398_v56 = vadd.f32 %v1397_v51, %v1396_v48  ;;  %v1415_v58 = vrot.slane %v1414_v52, 2 }
 0x7be   :  { %v1393_v59 = vadd.f32 %v1392_v53, %v1391_v16  ;;  %v1410_v60 = vrot.slane %v1409_v54, 1  ;;  %v1399_v57 = vrot.slane %v1398_v56, 1  ;;  %v1416_v61 = vadd.f32 %v1415_v58, %v1414_v52 }
 0x7c0   :  { %v1401_v62 = vmul.f32 0.125, %v1393_v59  ;;  %v1411_v26 = vadd.f32 %v1410_v60, %v1409_v54  ;;  %v1400_v63 = vadd.f32 %v1399_v57, %v1398_v56  ;;  %v1417_v0 = vrot.slane %v1416_v61, 1 }
 0x7c2   :  { %v1419_v1 = vmul.f32 0.125, %v1411_v26  ;;  %v1421_v3 = vmul.f32 %v1401_v62, %v1401_v62  ;;  %v1402_v4 = vmul.f32 0.125, %v1400_v63  ;;  %v1418_v5 = vadd.f32 %v1417_v0, %v1416_v61 }
 0x7c3   :  { %v1425_v13 = vsub.f32 %v1385_v34, %v1401_v62 }
 0x7c4   :  { %v1423_v7 = vsub.f32 %v1419_v1, %v1421_v3  ;;  %v1422_v8 = vmul.f32 %v1402_v4, %v1402_v4  ;;  %v1420_v9 = vmul.f32 0.125, %v1418_v5  ;;  %v1426_v20 = vsub.f32 %v1386_v39, %v1402_v4 }
 0x7c6   :  { %v1427_v6 = vadd.f32 1e-05, %v1423_v7  ;;  %v1424_v11 = vsub.f32 %v1420_v9, %v1422_v8 }
 0x7c8   :  { %3413 = vrsqrt.f32 %v1427_v6  ;;  %v1428_v12 = vadd.f32 1e-05, %v1424_v11 }
 0x7ca   :  { %3415 = vrsqrt.f32 %v1428_v12 }
 0x7d2   :  { %v3414_v18 = vpop.eup %3413 }
 0x7d3   :  { %v1431_v19 = vmul.f32 %v3414_v18, %v1425_v13 }
 0x7d4   :  { %v3416_v21 = vpop.eup %3415 }
 0x7d5   :  { %v1439_v22 = vmul.f32 %v2857_v10, %v1431_v19  ;;  %v1432_v23 = vmul.f32 %v3416_v21, %v1426_v20 }
 0x7d7   :  { %v1440_v17 = vmul.f32 %v2857_v10, %v1432_v23  ;;  %v3876_v14 = vadd.f32 %v2858_v24, %v1439_v22 }
 0x7d9   :  { %v3878_v25 = vadd.f32 %v2858_v24, %v1440_v17 }
 0x7db   :  { %v1449_v27 = vpack.c.bf16 %v3878_v25, %v3876_v14 }
 0x7dd   :  { %2867 = vmatmul.mubr.msk.bf16.vlgmr.msra.gmra.mrb[48].mxu0 %vm131_vm3, %v1449_v27 }
 0x7de   :  { %3151 = vmatprep.mubr.msk.bf16.mxu0 %vm3482_vm1, %v3481_v2 }
 0x8b0   :  { %v1512_v28 = vpop.f32.mrb[48].mxu0 }
 0x8b1   :  { %v1514_v29 = vpop.f32.mrb[49].mxu0  ;;  %v1541_v34 = vpack.c.bf16 %v1512_v28, %v1512_v28 }
 0x8b2   :  { %v1516_v31 = vpop.f32.mrb[50].mxu0 }
 0x8b3   :  { %v1518_v15 = vpop.f32.mrb[51].mxu0  ;;  %v3320_v32 = vpack.i.bf16 %v1516_v31, %v1512_v28  ;;  %v3889_v35 = vpack.c.bf16 %v1516_v31, %v1516_v31 }
 0x8b4   :  { %v3340_v33 = vpack.i.bf16 %v1518_v15, %v1514_v29 }
 0x8b5   :  { %3321 = vrot.lane.b32.xlu1 %v3320_v32, %s3487_s24  ;;  %3316 = vrot.lane.b32.xlu0 %v3320_v32, %s3485_s22 }
 0x8b9   :  { %1576 = vrot.lane.b32.xlu1 %v1541_v34, %s3486_s23  ;;  %3326 = vrot.lane.b32.xlu0 %v3320_v32, %s3484_s2 }
 0x8bd   :  { %1625 = vrot.lane.b32.xlu0 %v3889_v35, %s3486_s23 }
 0x927   :  { %v3322_v36 = vpop.permute.xlu1 %3321  ;;  %v3317_v37 = vpop.permute.xlu0 %3316 }
 0x928   :  { %v3319_v38 = vunpack.i.h.bf16 %v3317_v37  ;;  %v3318_v39 = vunpack.i.l.bf16 %v3317_v37  ;;  %v3324_v40 = vunpack.i.h.bf16 %v3322_v36  ;;  %v3323_v41 = vunpack.i.l.bf16 %v3322_v36 }
 0x92a   :  { %v1544_v42 = vpack.c.bf16 %v3319_v38, %v3319_v38  ;;  %v1543_v43 = vpack.c.bf16 %v3318_v39, %v3318_v39  ;;  %v1546_v46 = vpack.c.bf16 %v3324_v40, %v3324_v40  ;;  %v1545_v30 = vpack.c.bf16 %v3323_v41, %v3323_v41 }
 0x92b   :  { %v1577_v55 = vpop.permute.xlu1 %1576  ;;  %v3327_v44 = vpop.permute.xlu0 %3326 }
 0x92c   :  { %v1582_v45 = vsel %vm57_vm2, %v1577_v55, 0  ;;  %1674 = vrot.lane.b32.xlu1 %v1543_v43, %s3486_s23  ;;  %1723 = vrot.lane.b32.xlu0 %v1544_v42, %s3486_s23  ;;  %v3328_v47 = vunpack.i.l.bf16 %v3327_v44  ;;  %v3329_v48 = vunpack.i.h.bf16 %v3327_v44 }
 0x92d   :  { %3150 = vmatpush3.bf16.xpose.msra.mxu0 %v1582_v45 }
 0x92e   :  { %3155 = vmatprep.subr.bf16.mxu0 %v3481_v2  ;;  %v1547_v16 = vpack.c.bf16 %v3328_v47, %v3328_v47  ;;  %v1548_v50 = vpack.c.bf16 %v3329_v48, %v3329_v48 }
 0x92f   :  { %v1626_v49 = vpop.permute.xlu0 %1625 }
 0x930   :  { %1772 = vrot.lane.b32.xlu1 %v1545_v30, %s3486_s23  ;;  %1821 = vrot.lane.b32.xlu0 %v1546_v46, %s3486_s23  ;;  %v1631_v51 = vsel %vm57_vm2, %v1626_v49, 0 }
 0x934   :  { %3152 = vmatmul.mubr.msk.bf16.vlgmr.msra.gmra.mrb[52].mxu0 %vm57_vm2, %v1541_v34  ;;  %1870 = vrot.lane.b32.xlu1 %v1547_v16, %s3486_s23 }
 0x935   :  { %1919 = vrot.lane.b32.xlu0 %v1548_v50, %s3486_s23  ;;  %3156 = vmatpush3.bf16.xpose.msra.mxu0 %v1631_v51 }
 0x936   :  { %3157 = vmatprep.mubr.msk.bf16.mxu0 %vm3482_vm1, %v3481_v2  ;;  %3161 = vmatprep.subr.bf16.mxu0 %v3481_v2 }
 0x938   :  { %3336 = vrot.lane.b32.xlu1 %v3340_v33, %s3488_s25 }
 0x939   :  { %3331 = vrot.lane.b32.xlu0 %v3320_v32, %s3486_s23 }
 0x93c   :  { %3158 = vmatmul.mubr.msk.bf16.vlgmr.msra.gmra.mrb[56].mxu0 %vm57_vm2, %v3889_v35  ;;  %3341 = vrot.lane.b32.xlu1 %v3340_v33, %s3489_s26 }
 0x93d   :  { %3163 = vmatprep.mubr.msk.bf16.mxu0 %vm3482_vm1, %v3481_v2 }
 0x940   :  { %2071 = vrot.lane.b32.xlu1 %v1541_v34, %s3488_s25 }
 0x99e   :  { %v1675_v52 = vpop.permute.xlu1 %1674  ;;  %v1724_v53 = vpop.permute.xlu0 %1723 }
 0x99f   :  { %v1680_v54 = vsel %vm57_vm2, %v1675_v52, 0  ;;  %v1729_v56 = vsel %vm57_vm2, %v1724_v53, 0 }
 0x9a0   :  { %3162 = vmatpush3.bf16.xpose.msra.mxu0 %v1680_v54  ;;  %3168 = vmatpush3.bf16.xpose.msra.mxu1 %v1729_v56 }
 0x9a1   :  { %3173 = vmatprep.subr.bf16.mxu0 %v3481_v2  ;;  %3179 = vmatprep.subr.bf16.mxu1 %v3481_v2 }
 0x9a2   :  { %v1773_v58 = vpop.permute.xlu1 %1772  ;;  %v1822_v59 = vpop.permute.xlu0 %1821 }
 0x9a3   :  { %v1778_v57 = vsel %vm57_vm2, %v1773_v58, 0  ;;  %v1827_v61 = vsel %vm57_vm2, %v1822_v59, 0 }
 0x9a6   :  { %v1871_v60 = vpop.permute.xlu1 %1870 }
 0x9a7   :  { %3164 = vmatmul.mubr.msk.bf16.vlgmr.msra.gmra.mrb[60].mxu0 %vm57_vm2, %v1543_v43  ;;  %3170 = vmatmul.mubr.msk.bf16.vlgmr.msra.gmra.mrb[32].mxu1 %vm57_vm2, %v1544_v42  ;;  %v1920_v26 = vpop.permute.xlu0 %1919  ;;  %v1876_v0 = vsel %vm57_vm2, %v1871_v60, 0 }
 0x9a8   :  { %3174 = vmatpush3.bf16.xpose.msra.mxu0 %v1778_v57  ;;  %3180 = vmatpush3.bf16.xpose.msra.mxu1 %v1827_v61  ;;  %v1925_v1 = vsel %vm57_vm2, %v1920_v26, 0 }
 0x9a9   :  { %3175 = vmatprep.mubr.msk.bf16.mxu0 %vm3482_vm1, %v3481_v2  ;;  %3181 = vmatprep.mubr.msk.bf16.mxu1 %vm3482_vm1, %v3481_v2 }
 0x9aa   :  { %v3926_v62 = vpop.permute.xlu1 %3336  ;;  %3185 = vmatprep.subr.bf16.mxu0 %v3481_v2  ;;  %3191 = vmatprep.subr.bf16.mxu1 %v3481_v2 }
 0x9ab   :  { %v3332_v54 = vpop.permute.xlu0 %3331 }
 0x9ac   :  { %v3333_v56 = vunpack.i.l.bf16 %v3332_v54 }
 0x9ae   :  { %v3930_v63 = vpop.permute.xlu1 %3341  ;;  %v1569_v58 = vpack.c.bf16 %v3333_v56, %v3333_v56 }
 0x9af   :  { %3176 = vmatmul.mubr.msk.bf16.vlgmr.msra.gmra.mrb[64].mxu0 %vm57_vm2, %v1545_v30  ;;  %3182 = vmatmul.mubr.msk.bf16.vlgmr.msra.gmra.mrb[36].mxu1 %vm57_vm2, %v1546_v46  ;;  %v3343_v56 = vunpack.i.l.bf16 %v3930_v63 }
 0x9b0   :  { %3186 = vmatpush3.bf16.xpose.msra.mxu0 %v1876_v0  ;;  %3192 = vmatpush3.bf16.xpose.msra.mxu1 %v1925_v1 }
 0x9b1   :  { %3187 = vmatprep.mubr.msk.bf16.mxu0 %vm3482_vm1, %v3481_v2  ;;  %3193 = vmatprep.mubr.msk.bf16.mxu1 %vm3482_vm1, %v3481_v2 }
 0x9b2   :  { %3197 = vmatprep.subr.bf16.mxu0 %v3481_v2  ;;  %3203 = vmatprep.subr.bf16.mxu1 %v3481_v2  ;;  %v2072_v3 = vpop.permute.xlu1 %2071 }
 0x9b3   :  { %v2077_v4 = vsel %vm61_vm0, %v2072_v3, 0  ;;  %v3334_v3 = vunpack.i.h.bf16 %v3332_v54 }
 0x9b7   :  { %3188 = vmatmul.mubr.msk.bf16.vlgmr.msra.gmra.mrb[68].mxu0 %vm57_vm2, %v1547_v16  ;;  %3194 = vmatmul.mubr.msk.bf16.vlgmr.msra.gmra.mrb[40].mxu1 %vm57_vm2, %v1548_v50 }
 0x9b8   :  { %3198 = vmatpush3.bf16.msra.mxu0 %v2077_v4  ;;  %3199 = vmatprep.mubr.msk.bf16.mxu0 %vm3482_vm1, %v3481_v2  ;;  %v1570_v4 = vpack.c.bf16 %v3334_v3, %v3334_v3 }
 0x9b9   :  { %3209 = vmatprep.subr.bf16.mxu0 %v3481_v2  ;;  %3205 = vmatprep.mubr.msk.bf16.mxu1 %vm3482_vm1, %v3481_v2 }
 0xa07   :  { %v1618_v5 = vpop.f32.mrb[52].mxu0 }
 0xa08   :  { %v1967_v7 = vmul.f32 0.35355338, %v1618_v5  ;;  %v3153_v8 = vpop.f32.mrb[53].mxu0 }
 0xa09   :  { %v1621_v9 = vpop.f32.mrb[54].mxu0 }
 0xa0a   :  { %v3154_v6 = vpop.f32.mrb[55].mxu0  ;;  %v1975_v11 = vsel %vm57_vm2, %v1967_v7, -inf }
 0xa0b   :  { %1976 = vmax.xlane.f32.xlu1 %v1975_v11  ;;  %v3339_v6 = vunpack.i.h.bf16 %v3926_v62 }
 0xa0d   :  { %v1572_v11 = vpack.c.bf16 %v3339_v6, %v3339_v6 }
 0xa0f   :  { %v1667_v12 = vpop.f32.mrb[56].mxu0 }
 0xa10   :  { %v3951_v13 = vmul.f32 0.35355338, %v1667_v12  ;;  %v3159_v18 = vpop.f32.mrb[57].mxu0 }
 0xa11   :  { %v1670_v10 = vpop.f32.mrb[58].mxu0 }
 0xa12   :  { %v3160_v19 = vpop.f32.mrb[59].mxu0  ;;  %v1978_v20 = vsel %vm57_vm2, %v3951_v13, -inf }
 0xa13   :  { %1979 = vmax.xlane.f32.xlu0 %v1978_v20 }
 0xa7a   :  { %v1716_v21 = vpop.f32.mrb[60].mxu0  ;;  %v1765_v22 = vpop.f32.mrb[32].mxu1 }
 0xa7b   :  { %v3955_v23 = vmul.f32 0.35355338, %v1716_v21  ;;  %v3957_v24 = vmul.f32 0.35355338, %v1765_v22  ;;  %v3165_v17 = vpop.f32.mrb[61].mxu0  ;;  %v3171_v27 = vpop.f32.mrb[33].mxu1 }
 0xa7c   :  { %v1719_v28 = vpop.f32.mrb[62].mxu0  ;;  %v1768_v29 = vpop.f32.mrb[34].mxu1 }
 0xa7d   :  { %v3166_v31 = vpop.f32.mrb[63].mxu0  ;;  %v3172_v15 = vpop.f32.mrb[35].mxu1  ;;  %v1984_v32 = vsel %vm57_vm2, %v3957_v24, -inf  ;;  %v1981_v33 = vsel %vm57_vm2, %v3955_v23, -inf }
 0xa7e   :  { %1985 = vmax.xlane.f32.xlu1 %v1984_v32  ;;  %1982 = vmax.xlane.f32.xlu0 %v1981_v33 }
 0xa82   :  { %v1814_v34 = vpop.f32.mrb[64].mxu0  ;;  %v1863_v36 = vpop.f32.mrb[36].mxu1 }
 0xa83   :  { %v1971_v37 = vmul.f32 0.35355338, %v1814_v34  ;;  %v3963_v38 = vmul.f32 0.35355338, %v1863_v36  ;;  %v3177_v39 = vpop.f32.mrb[65].mxu0  ;;  %v3183_v40 = vpop.f32.mrb[37].mxu1 }
 0xa84   :  { %v1817_v41 = vpop.f32.mrb[66].mxu0  ;;  %v1866_v42 = vpop.f32.mrb[38].mxu1  ;;  %v3338_v40 = vunpack.i.l.bf16 %v3926_v62 }
 0xa85   :  { %v3178_v43 = vpop.f32.mrb[67].mxu0  ;;  %v3184_v55 = vpop.f32.mrb[39].mxu1  ;;  %v1990_v44 = vsel %vm57_vm2, %v3963_v38, -inf  ;;  %v1987_v45 = vsel %vm57_vm2, %v1971_v37, -inf  ;;  %v3344_v42 = vunpack.i.h.bf16 %v3930_v63 }
 0xa86   :  { %1991 = vmax.xlane.f32.xlu1 %v1990_v44  ;;  %1988 = vmax.xlane.f32.xlu0 %v1987_v45  ;;  %v1571_v41 = vpack.c.bf16 %v3338_v40, %v3338_v40 }
 0xa87   :  { %v1574_v43 = vpack.c.bf16 %v3344_v42, %v3344_v42 }
 0xa8a   :  { %v1912_v46 = vpop.f32.mrb[68].mxu0  ;;  %v1961_v30 = vpop.f32.mrb[40].mxu1 }
 0xa8b   :  { %v1973_v47 = vmul.f32 0.35355338, %v1912_v46  ;;  %v3189_v48 = vpop.f32.mrb[69].mxu0  ;;  %v3195_v49 = vpop.f32.mrb[41].mxu1  ;;  %v3972_v61 = vmul.f32 0.35355338, %v1961_v30 }
 0xa8c   :  { %v1915_v16 = vpop.f32.mrb[70].mxu0  ;;  %v1964_v50 = vpop.f32.mrb[42].mxu1 }
 0xa8d   :  { %v3190_v51 = vpop.f32.mrb[71].mxu0  ;;  %v3196_v52 = vpop.f32.mrb[43].mxu1  ;;  %v1993_v53 = vsel %vm57_vm2, %v1973_v47, -inf  ;;  %v1996_v26 = vsel %vm57_vm2, %v3972_v61, -inf }
 0xa8e   :  { %1994 = vmax.xlane.f32.xlu0 %v1993_v53 }
 0xa97   :  { %2168 = vrot.lane.b32.xlu1 %v1569_v58, %s3488_s25  ;;  %v1573_v58 = vpack.c.bf16 %v3343_v56, %v3343_v56 }
 0xa98   :  { %v1977_v59 = vpop.xlane.xlu1 %1976 }
 0xa99   :  { %v1999_v60 = vsub.f32 %v1967_v7, %v1977_v59 }
 0xa9b   :  { %v2007_v57 = vmul.f32 1.442695, %v1999_v60 }
 0xa9d   :  { %3417 = vpow2.f32 %v2007_v57 }
 0xaa4   :  { %2119 = vrot.lane.b32.xlu0 %v3889_v35, %s3488_s25  ;;  %v1980_v35 = vpop.xlane.xlu0 %1979 }
 0xaa5   :  { %v2000_v5 = vsub.f32 %v3951_v13, %v1980_v35 }
 0xaa7   :  { %v3976_v0 = vpop.eup %3417  ;;  %v2009_v7 = vmul.f32 1.442695, %v2000_v5 }
 0xaa8   :  { %v2023_v1 = vsel %vm57_vm2, %v3976_v0, 0.0 }
 0xaa9   :  { %3419 = vpow2.f32 %v2009_v7 }
 0xab3   :  { %v3982_v8 = vpop.eup %3419 }
 0xab4   :  { %v2026_v9 = vsel %vm57_vm2, %v3982_v8, 0.0 }
 0xabb   :  { %1997 = vmax.xlane.f32.xlu1 %v1996_v26 }
 0xac3   :  { %2024 = vadd.xlane.f32.xlu0 %v2023_v1 }
 0xacc   :  { %2217 = vrot.lane.b32.xlu1 %v1570_v4, %s3488_s25 }
 0xaf0   :  { %2027 = vadd.xlane.f32.xlu1 %v2026_v9 }
 0xb01   :  { %2315 = vrot.lane.b32.xlu1 %v1572_v11, %s3488_s25 }
 0xb0b   :  { %v1986_v12 = vpop.xlane.xlu1 %1985  ;;  %v1983_v18 = vpop.xlane.xlu0 %1982 }
 0xb0c   :  { %v2002_v10 = vsub.f32 %v3957_v24, %v1986_v12  ;;  %v2001_v19 = vsub.f32 %v3955_v23, %v1983_v18 }
 0xb0e   :  { %v2011_v13 = vmul.f32 1.442695, %v2001_v19  ;;  %v2013_v20 = vmul.f32 1.442695, %v2002_v10 }
 0xb10   :  { %3421 = vpow2.f32 %v2011_v13 }
 0xb11   :  { %3423 = vpow2.f32 %v2013_v20 }
 0xb13   :  { %v1989_v21 = vpop.xlane.xlu0 %1988  ;;  %v1992_v55 = vpop.xlane.xlu1 %1991 }
 0xb14   :  { %v2003_v22 = vsub.f32 %v1971_v37, %v1989_v21  ;;  %v2004_v44 = vsub.f32 %v3963_v38, %v1992_v55 }
 0xb16   :  { %v2015_v17 = vmul.f32 1.442695, %v2003_v22  ;;  %v2017_v45 = vmul.f32 1.442695, %v2004_v44 }
 0xb17   :  { %v2169_v46 = vpop.permute.xlu1 %2168 }
 0xb18   :  { %3425 = vpow2.f32 %v2015_v17  ;;  %v2174_v54 = vsel %vm61_vm0, %v2169_v46, 0  ;;  %v3367_v46 = vld [vmem:[%s4159_s7 + $0x10] sm:$0xff]  }
 0xb1a   :  { %v3990_v27 = vpop.eup %3421 }
 0xb1b   :  { %v1995_v28 = vpop.xlane.xlu0 %1994  ;;  %v2029_v31 = vsel %vm57_vm2, %v3990_v27, 0.0  ;;  %v3994_v15 = vpop.eup %3423 }
 0xb1c   :  { %v2005_v29 = vsub.f32 %v1973_v47, %v1995_v28  ;;  %2030 = vadd.xlane.f32.xlu0 %v2029_v31  ;;  %v2032_v33 = vsel %vm57_vm2, %v3994_v15, 0.0 }
 0xb1e   :  { %v2019_v24 = vmul.f32 1.442695, %v2005_v29 }
 0xb1f   :  { %v2120_v23 = vpop.permute.xlu0 %2119 }
 0xb20   :  { %3427 = vpow2.f32 %v2019_v24  ;;  %v2125_v32 = vsel %vm61_vm0, %v2120_v23, 0  ;;  %2033 = vadd.xlane.f32.xlu0 %v2032_v33 }
 0xb21   :  { %3204 = vmatpush3.bf16.msra.mxu1 %v2125_v32  ;;  %3429 = vpow2.f32 %v2017_v45 }
 0xb22   :  { %3215 = vmatprep.subr.bf16.mxu1 %v3481_v2  ;;  %v4000_v34 = vpop.eup %3425 }
 0xb23   :  { %v2035_v36 = vsel %vm57_vm2, %v4000_v34, 0.0 }
 0xb25   :  { %2036 = vadd.xlane.f32.xlu1 %v2035_v36 }
 0xb2a   :  { %v4004_v37 = vpop.eup %3427 }
 0xb2b   :  { %v2041_v39 = vsel %vm57_vm2, %v4004_v37, 0.0  ;;  %v4014_v49 = vpop.eup %3429 }
 0xb2c   :  { %2042 = vadd.xlane.f32.xlu1 %v2041_v39  ;;  %v2038_v16 = vsel %vm57_vm2, %v4014_v49, 0.0 }
 0xb36   :  { %2266 = vrot.lane.b32.xlu0 %v1571_v41, %s3488_s25 }
 0xb3d   :  { %2413 = vrot.lane.b32.xlu1 %v1574_v43, %s3488_s25 }
 0xb48   :  { %v1998_v30 = vpop.xlane.xlu1 %1997 }
 0xb49   :  { %v2006_v47 = vsub.f32 %v3972_v61, %v1998_v30  ;;  %v3368_v30 = vld [vmem:[%s4159_s7 + $0x18] sm:$0xff]  }
 0xb4b   :  { %v2021_v48 = vmul.f32 1.442695, %v2006_v47  ;;  %v3369_v47 = vld [vmem:[%s4161_s9 + $0x40] sm:$0xff]  }
 0xb4c   :  { %v2218_v59 = vpop.permute.xlu1 %2217 }
 0xb4d   :  { %3431 = vpow2.f32 %v2021_v48  ;;  %v3370_v48 = vld [vmem:[%s4161_s9 + $0x48] sm:$0xff]  }
 0xb50   :  { %v2025_v62 = vpop.xlane.xlu0 %2024 }
 0xb51   :  { %3433 = vrcp.f32 %v2025_v62  ;;  %v3371_v62 = vld [vmem:[%s4161_s9 + $0x50] sm:$0xff]  }
 0xb55   :  { %2039 = vadd.xlane.f32.xlu0 %v2038_v16  ;;  %v3373_v16 = vld [vmem:[%s4161_s9 + $0x60] sm:$0xff]  }
 0xb57   :  { %v4018_v50 = vpop.eup %3431 }
 0xb58   :  { %v2044_v38 = vsel %vm57_vm2, %v4018_v50, 0.0 }
 0xb59   :  { %2045 = vadd.xlane.f32.xlu0 %v2044_v38 }
 0xb5b   :  { %v3434_v51 = vpop.eup %3433 }
 0xb5c   :  { %v2048_v52 = vmul.f32 %v3434_v51, %v3976_v0  ;;  %v2223_v0 = vsel %vm61_vm0, %v2218_v59, 0 }
 0xb5e   :  { %v2063_v53 = vpack.c.bf16 %v2048_v52, %v2048_v52 }
 0xb60   :  { %3200 = vmatmul.mubr.msk.bf16.vlgmr.msra.gmra.mrb[72].mxu0 %vm57_vm2, %v2063_v53  ;;  %v3374_v53 = vld [vmem:[%s4161_s9 + $0x68] sm:$0xff]  }
 0xb61   :  { %3210 = vmatpush3.bf16.msra.mxu0 %v2174_v54  ;;  %3211 = vmatprep.mubr.msk.bf16.mxu0 %vm3482_vm1, %v3481_v2 }
 0xb62   :  { %3221 = vmatprep.subr.bf16.mxu0 %v3481_v2 }
 0xb6f   :  { %2364 = vrot.lane.b32.xlu0 %v1573_v58, %s3488_s25 }
 0xb7d   :  { %v2028_v60 = vpop.xlane.xlu1 %2027 }
 0xb7e   :  { %3435 = vrcp.f32 %v2028_v60 }
 0xb81   :  { %v2316_v1 = vpop.permute.xlu1 %2315 }
 0xb82   :  { %v2321_v10 = vsel %vm61_vm0, %v2316_v1, 0 }
 0xb88   :  { %v3436_v57 = vpop.eup %3435 }
 0xb89   :  { %v2050_v61 = vmul.f32 %v3436_v57, %v3982_v8 }
 0xb8b   :  { %v2064_v26 = vpack.c.bf16 %v2050_v61, %v2050_v61 }
 0xb8d   :  { %3206 = vmatmul.mubr.msk.bf16.vlgmr.msra.gmra.mrb[44].mxu1 %vm57_vm2, %v2064_v26 }
 0xb8e   :  { %3216 = vmatpush3.bf16.msra.mxu1 %v2223_v0  ;;  %3217 = vmatprep.mubr.msk.bf16.mxu1 %vm3482_vm1, %v3481_v2 }
 0xb8f   :  { %3227 = vmatprep.subr.bf16.mxu1 %v3481_v2 }
 0xba9   :  { %v2031_v63 = vpop.xlane.xlu0 %2030 }
 0xbaa   :  { %3437 = vrcp.f32 %v2031_v63 }
 0xbad   :  { %v2034_v3 = vpop.xlane.xlu0 %2033 }
 0xbae   :  { %3439 = vrcp.f32 %v2034_v3 }
 0xbb1   :  { %v2267_v7 = vpop.permute.xlu0 %2266 }
 0xbb2   :  { %v2037_v4 = vpop.xlane.xlu1 %2036  ;;  %v2272_v11 = vsel %vm61_vm0, %v2267_v7, 0 }
 0xbb3   :  { %3441 = vrcp.f32 %v2037_v4  ;;  %v2885_v4 = vld [vmem:[%s4156_s4 + $0x1] ss:$0 sm:$0xff] }
 0xbb4   :  { %v3438_v35 = vpop.eup %3437 }
 0xbb5   :  { %v2052_v5 = vmul.f32 %v3438_v35, %v3990_v27 }
 0xbb7   :  { %v2065_v8 = vpack.c.bf16 %v2052_v5, %v2052_v5 }
 0xbb8   :  { %v3440_v9 = vpop.eup %3439 }
 0xbb9   :  { %v2054_v6 = vmul.f32 %v3440_v9, %v3994_v15  ;;  %3212 = vmatmul.mubr.msk.bf16.vlgmr.msra.gmra.mrb[76].mxu0 %vm57_vm2, %v2065_v8  ;;  %v2043_v20 = vpop.xlane.xlu1 %2042 }
 0xbba   :  { %3222 = vmatpush3.bf16.msra.mxu0 %v2272_v11  ;;  %3223 = vmatprep.mubr.msk.bf16.mxu0 %vm3482_vm1, %v3481_v2  ;;  %3443 = vrcp.f32 %v2043_v20 }
 0xbbb   :  { %v2066_v12 = vpack.c.bf16 %v2054_v6, %v2054_v6  ;;  %3233 = vmatprep.subr.bf16.mxu0 %v3481_v2 }
 0xbbd   :  { %v3442_v18 = vpop.eup %3441  ;;  %3218 = vmatmul.mubr.msk.bf16.vlgmr.msra.gmra.mrb[48].mxu1 %vm57_vm2, %v2066_v12  ;;  %v2414_v23 = vpop.permute.xlu1 %2413 }
 0xbbe   :  { %v2056_v19 = vmul.f32 %v3442_v18, %v4000_v34  ;;  %3228 = vmatpush3.bf16.msra.mxu1 %v2321_v10  ;;  %3229 = vmatprep.mubr.msk.bf16.mxu1 %vm3482_vm1, %v3481_v2  ;;  %v2419_v34 = vsel %vm61_vm0, %v2414_v23, 0 }
 0xbbf   :  { %3239 = vmatprep.subr.bf16.mxu1 %v3481_v2 }
 0xbc0   :  { %v2067_v13 = vpack.c.bf16 %v2056_v19, %v2056_v19 }
 0xbc2   :  { %3224 = vmatmul.mubr.msk.bf16.vlgmr.msra.gmra.mrb[80].mxu0 %vm57_vm2, %v2067_v13 }
 0xbc3   :  { %3235 = vmatprep.mubr.msk.bf16.mxu0 %vm3482_vm1, %v3481_v2 }
 0xbc4   :  { %v3444_v22 = vpop.eup %3443 }
 0xbc5   :  { %v2060_v27 = vmul.f32 %v3444_v22, %v4004_v37 }
 0xbc7   :  { %v2069_v15 = vpack.c.bf16 %v2060_v27, %v2060_v27 }
 0xbe2   :  { %v2040_v21 = vpop.xlane.xlu0 %2039 }
 0xbe3   :  { %3445 = vrcp.f32 %v2040_v21 }
 0xbe6   :  { %v2046_v17 = vpop.xlane.xlu0 %2045 }
 0xbe7   :  { %3447 = vrcp.f32 %v2046_v17 }
 0xbea   :  { %v2365_v28 = vpop.permute.xlu0 %2364 }
 0xbeb   :  { %v2370_v29 = vsel %vm61_vm0, %v2365_v28, 0 }
 0xbec   :  { %3234 = vmatpush3.bf16.msra.mxu0 %v2370_v29 }
 0xbed   :  { %v3446_v31 = vpop.eup %3445  ;;  %3245 = vmatprep.subr.bf16.mxu0 %v3481_v2 }
 0xbee   :  { %v2058_v24 = vmul.f32 %v3446_v31, %v4014_v49  ;;  %v3372_v49 = vld [vmem:[%s4161_s9 + $0x58] sm:$0xff]  }
 0xbef   :  { %3236 = vmatmul.mubr.msk.bf16.vlgmr.msra.gmra.mrb[84].mxu0 %vm57_vm2, %v2069_v15 }
 0xbf0   :  { %v2068_v32 = vpack.c.bf16 %v2058_v24, %v2058_v24  ;;  %3249 = vmatprep.mubr.msk.bf16.mxu0 %vm3482_vm1, %v3481_v2  ;;  %3246 = vmatpush3.bf16.msra.mxu0 %v3367_v46 }
 0xbf1   :  { %v3448_v33 = vpop.eup %3447  ;;  %3247 = vmatprep.subr.bf16.mxu0 %v3481_v2 }
 0xbf2   :  { %3230 = vmatmul.mubr.msk.bf16.vlgmr.msra.gmra.mrb[52].mxu1 %vm57_vm2, %v2068_v32  ;;  %v2062_v36 = vmul.f32 %v3448_v33, %v4018_v50 }
 0xbf3   :  { %3240 = vmatpush3.bf16.msra.mxu1 %v2419_v34  ;;  %3241 = vmatprep.mubr.msk.bf16.mxu1 %vm3482_vm1, %v3481_v2 }
 0xbf4   :  { %3253 = vmatprep.subr.bf16.mxu1 %v3481_v2  ;;  %v2070_v37 = vpack.c.bf16 %v2062_v36, %v2062_v36  ;;  %3248 = vmatpush3.bf16.msra.mxu0 %v3368_v30 }
 0xbfa   :  { %3242 = vmatmul.mubr.msk.bf16.vlgmr.msra.gmra.mrb[56].mxu1 %vm57_vm2, %v2070_v37 }
 0xbfb   :  { %3269 = vmatprep.mubr.msk.bf16.mxu1 %vm3482_vm1, %v3481_v2  ;;  %3254 = vmatpush3.bf16.msra.mxu1 %v3369_v47 }
 0xbfc   :  { %3255 = vmatprep.subr.bf16.mxu1 %v3481_v2 }
 0xbff   :  { %3256 = vmatpush3.bf16.msra.mxu1 %v3370_v48 }
 0xc00   :  { %3257 = vmatprep.subr.bf16.mxu1 %v3481_v2 }
 0xc03   :  { %3258 = vmatpush3.bf16.msra.mxu1 %v3371_v62 }
 0xc04   :  { %3259 = vmatprep.subr.bf16.mxu1 %v3481_v2 }
 0xc07   :  { %3260 = vmatpush3.bf16.msra.mxu1 %v3372_v49 }
 0xc08   :  { %3261 = vmatprep.subr.bf16.mxu1 %v3481_v2 }
 0xc0b   :  { %3262 = vmatpush3.bf16.msra.mxu1 %v3373_v16 }
 0xc0c   :  { %3263 = vmatprep.subr.bf16.mxu1 %v3481_v2 }
 0xc0f   :  { %3264 = vmatpush3.bf16.msra.mxu1 %v3374_v53 }
 0xc10   :  { %3265 = vmatprep.subr.bf16.mxu1 %v3481_v2 }
 0xc33   :  { %v2113_v39 = vpop.f32.mrb[72].mxu0 }
 0xc34   :  { %v3201_v40 = vpop.f32.mrb[73].mxu0 }
 0xc35   :  { %v2116_v41 = vpop.f32.mrb[74].mxu0 }
 0xc36   :  { %v3202_v42 = vpop.f32.mrb[75].mxu0 }
 0xc60   :  { %v2161_v43 = vpop.f32.mrb[44].mxu1 }
 0xc61   :  { %v3207_v55 = vpop.f32.mrb[45].mxu1 }
 0xc62   :  { %v2164_v44 = vpop.f32.mrb[46].mxu1 }
 0xc63   :  { %v3208_v45 = vpop.f32.mrb[47].mxu1 }
 0xc8c   :  { %v2210_v50 = vpop.f32.mrb[76].mxu0 }
 0xc8d   :  { %v2461_v38 = vadd.f32 %v2210_v50, %v2113_v39  ;;  %v3213_v51 = vpop.f32.mrb[77].mxu0 }
 0xc8e   :  { %v2213_v52 = vpop.f32.mrb[78].mxu0 }
 0xc8f   :  { %v3214_v54 = vpop.f32.mrb[79].mxu0 }
 0xc90   :  { %v2259_v56 = vpop.f32.mrb[48].mxu1 }
 0xc91   :  { %v2462_v58 = vadd.f32 %v2259_v56, %v2161_v43  ;;  %v3219_v59 = vpop.f32.mrb[49].mxu1 }
 0xc92   :  { %v2262_v60 = vpop.f32.mrb[50].mxu1 }
 0xc93   :  { %v3220_v57 = vpop.f32.mrb[51].mxu1 }
 0xc95   :  { %v2308_v61 = vpop.f32.mrb[80].mxu0 }
 0xc96   :  { %v2463_v26 = vadd.f32 %v2461_v38, %v2308_v61  ;;  %v3225_v0 = vpop.f32.mrb[81].mxu0 }
 0xc97   :  { %v2311_v63 = vpop.f32.mrb[82].mxu0 }
 0xc98   :  { %v3226_v1 = vpop.f32.mrb[83].mxu0 }
 0xcc2   :  { %v2406_v3 = vpop.f32.mrb[84].mxu0 }
 0xcc3   :  { %v2465_v35 = vadd.f32 %v2463_v26, %v2406_v3  ;;  %v3237_v5 = vpop.f32.mrb[85].mxu0  ;;  %v2888_v3 = vld [vmem:[%s4157_s5 + $0x1] ss:$0 sm:$0xff] }
 0xcc4   :  { %v2409_v7 = vpop.f32.mrb[86].mxu0 }
 0xcc5   :  { %v2475_v8 = vadd.f32 %v2885_v4, %v2465_v35  ;;  %v2357_v9 = vpop.f32.mrb[52].mxu1  ;;  %v3238_v6 = vpop.f32.mrb[87].mxu0 }
 0xcc6   :  { %v2464_v11 = vadd.f32 %v2462_v58, %v2357_v9  ;;  %v3231_v12 = vpop.f32.mrb[53].mxu1 }
 0xcc7   :  { %v2481_v18 = vadd.f32 %v2475_v8, %v3876_v14  ;;  %v2360_v10 = vpop.f32.mrb[54].mxu1  ;;  %v2889_v8 = vld [vmem:[%s4158_s6 + $0x1] ss:$0 sm:$0xff] }
 0xcc8   :  { %v3232_v19 = vpop.f32.mrb[55].mxu1  ;;  %v3376_v10 = vld [vmem:[%s4161_s9 + $0x78] sm:$0xff]  }
 0xcc9   :  { %v2483_v13 = vsel %vm131_vm3, %v2481_v18, 0.0  ;;  %v2499_v20 = vmul.f32 %v2481_v18, %v2481_v18  ;;  %v2895_v19 = vld [vmem:[%s4160_s8 + $0x1] ss:$0 sm:$0xff] }
 0xcca   :  { %v2484_v21 = vrot.slane %v2483_v13, 4 }
 0xccb   :  { %v2501_v22 = vsel %vm131_vm3, %v2499_v20, 0.0 }
 0xccc   :  { %v2485_v17 = vadd.f32 %v2484_v21, %v2483_v13  ;;  %v2502_v27 = vrot.slane %v2501_v22, 4 }
 0xccd   :  { %v2455_v28 = vpop.f32.mrb[56].mxu1 }
 0xcce   :  { %v2486_v29 = vrot.slane %v2485_v17, 2  ;;  %v2503_v31 = vadd.f32 %v2502_v27, %v2501_v22  ;;  %v2466_v15 = vadd.f32 %v2464_v11, %v2455_v28  ;;  %v3243_v24 = vpop.f32.mrb[57].mxu1 }
 0xccf   :  { %v2458_v23 = vpop.f32.mrb[58].mxu1 }
 0xcd0   :  { %v2487_v32 = vadd.f32 %v2486_v29, %v2485_v17  ;;  %v2504_v33 = vrot.slane %v2503_v31, 2  ;;  %v2476_v34 = vadd.f32 %v2885_v4, %v2466_v15  ;;  %v3244_v14 = vpop.f32.mrb[59].mxu1 }
 0xcd2   :  { %v2488_v36 = vrot.slane %v2487_v32, 1  ;;  %v2505_v37 = vadd.f32 %v2504_v33, %v2503_v31  ;;  %v2482_v39 = vadd.f32 %v2476_v34, %v3878_v25 }
 0xcd4   :  { %v2489_v40 = vadd.f32 %v2488_v36, %v2487_v32  ;;  %v2506_v41 = vrot.slane %v2505_v37, 1  ;;  %v2490_v42 = vsel %vm131_vm3, %v2482_v39, 0.0  ;;  %v2500_v43 = vmul.f32 %v2482_v39, %v2482_v39 }
 0xcd5   :  { %v2491_v55 = vrot.slane %v2490_v42, 4 }
 0xcd6   :  { %v2497_v44 = vmul.f32 0.125, %v2489_v40  ;;  %v2507_v45 = vadd.f32 %v2506_v41, %v2505_v37  ;;  %v2508_v46 = vsel %vm131_vm3, %v2500_v43, 0.0 }
 0xcd7   :  { %v2492_v30 = vadd.f32 %v2491_v55, %v2490_v42  ;;  %v2509_v47 = vrot.slane %v2508_v46, 4 }
 0xcd8   :  { %v2515_v48 = vmul.f32 0.125, %v2507_v45  ;;  %v2517_v62 = vmul.f32 %v2497_v44, %v2497_v44  ;;  %v2521_v63 = vsub.f32 %v2481_v18, %v2497_v44  ;;  %v3375_v18 = vld [vmem:[%s4161_s9 + $0x70] sm:$0xff]  }
 0xcd9   :  { %v2493_v49 = vrot.slane %v2492_v30, 2  ;;  %v2510_v16 = vadd.f32 %v2509_v47, %v2508_v46  ;;  %3266 = vmatpush3.bf16.msra.mxu1 %v3375_v18 }
 0xcda   :  { %v2519_v50 = vsub.f32 %v2515_v48, %v2517_v62  ;;  %3267 = vmatprep.subr.bf16.mxu1 %v3481_v2  ;;  %v2916_v2 = vld [vmem:[%s4162_s10 + $0x1] ss:$0 sm:$0xff] }
 0xcdb   :  { %v2494_v38 = vadd.f32 %v2493_v49, %v2492_v30  ;;  %v2511_v51 = vrot.slane %v2510_v16, 2 }
 0xcdc   :  { %v2523_v53 = vadd.f32 1e-05, %v2519_v50 }
 0xcdd   :  { %v2495_v25 = vrot.slane %v2494_v38, 1  ;;  %v2512_v52 = vadd.f32 %v2511_v51, %v2510_v16  ;;  %3268 = vmatpush3.bf16.msra.mxu1 %v3376_v10 }
 0xcde   :  { %3449 = vrsqrt.f32 %v2523_v53 }
 0xcdf   :  { %v2496_v54 = vadd.f32 %v2495_v25, %v2494_v38  ;;  %v2513_v56 = vrot.slane %v2512_v52, 1 }
 0xce1   :  { %v2498_v58 = vmul.f32 0.125, %v2496_v54  ;;  %v2514_v59 = vadd.f32 %v2513_v56, %v2512_v52 }
 0xce3   :  { %v2516_v60 = vmul.f32 0.125, %v2514_v59  ;;  %v2518_v57 = vmul.f32 %v2498_v58, %v2498_v58  ;;  %v2522_v4 = vsub.f32 %v2482_v39, %v2498_v58 }
 0xce5   :  { %v2520_v61 = vsub.f32 %v2516_v60, %v2518_v57 }
 0xce7   :  { %v2524_v26 = vadd.f32 1e-05, %v2520_v61 }
 0xce8   :  { %v3450_v0 = vpop.eup %3449 }
 0xce9   :  { %3451 = vrsqrt.f32 %v2524_v26  ;;  %v2527_v1 = vmul.f32 %v3450_v0, %v2521_v63 }
 0xceb   :  { %v2535_v5 = vmul.f32 %v2888_v3, %v2527_v1 }
 0xced   :  { %v2543_v6 = vadd.f32 %v2889_v8, %v2535_v5 }
 0xcf3   :  { %v3452_v35 = vpop.eup %3451 }
 0xcf4   :  { %v2528_v7 = vmul.f32 %v3452_v35, %v2522_v4 }
 0xcf6   :  { %v2536_v9 = vmul.f32 %v2888_v3, %v2528_v7 }
 0xcf8   :  { %v2544_v11 = vadd.f32 %v2889_v8, %v2536_v9 }
 0xcfa   :  { %v2545_v12 = vpack.c.bf16 %v2544_v11, %v2543_v6 }
 0xcfc   :  { %3250 = vmatmul.mubr.msk.bf16.vlgmr.msra.gmra.mrb[88].mxu0 %vm131_vm3, %v2545_v12  ;;  %v2927_v12 = vld [vmem:[%s4163_s11 + $0x1] ss:$0 sm:$0xff]  ;;  %s3457_s11 = scalar_lea.vmem %s2808_s27, 256 }
 0xcfd   :  { %p3458_p0 = scmp.ne.s32.totalorder %s2808_s27, %s3457_s11  ;;  %p3463_p2 = scmp.lt.s32.totalorder %s3457_s11, %s3457_s11 }
 0xcff   :  { %p3464_p3 = por %p3463_p2, %p3462_p1 }
 0xd01   :  { %p3465_p4 = pnand %p3464_p3, %p3458_p0 }
 0xdcf   :  { %v2608_v13 = vpop.f32.mrb[88].mxu0 }
 0xdd0   :  { %v2609_v20 = vadd.f32 %v2895_v19, %v2608_v13  ;;  %v3251_v21 = vpop.f32.mrb[89].mxu0 }
 0xdd1   :  { %v2611_v22 = vpop.f32.mrb[90].mxu0 }
 0xdd2   :  { %v2612_v17 = vadd.f32 %v2895_v19, %v2611_v22  ;;  %v3252_v27 = vpop.f32.mrb[91].mxu0  ;;  %v2615_v28 = vmax.f32 %v2609_v20, 0.0  ;;  %v2928_v19 = vld [vmem:[%s4164_s12 + $0x1] ss:$0 sm:$0xff] }
 0xdd4   :  { %v2616_v29 = vmax.f32 %v2612_v17, 0.0 }
 0xdd6   :  { %v2617_v31 = vpack.c.bf16 %v2616_v29, %v2615_v28 }
 0xdd8   :  { %3270 = vmatmul.mubr.bf16.vlgmr.msra.gmra.mrb[60].mxu1 %v2617_v31 }
 0xeab   :  { %v2725_v15 = vpop.f32.mrb[60].mxu1 }
 0xeac   :  { %v2726_v24 = vadd.f32 %v2916_v2, %v2725_v15  ;;  %v3271_v23 = vpop.f32.mrb[61].mxu1 }
 0xead   :  { %v2728_v32 = vpop.f32.mrb[62].mxu1 }
 0xeae   :  { %v2736_v33 = vadd.f32 %v2726_v24, %v2543_v6  ;;  %v2729_v34 = vadd.f32 %v2916_v2, %v2728_v32  ;;  %v3272_v14 = vpop.f32.mrb[63].mxu1 }
 0xeb0   :  { %v2738_v36 = vsel %vm131_vm3, %v2736_v33, 0.0  ;;  %v2754_v37 = vmul.f32 %v2736_v33, %v2736_v33  ;;  %v2737_v39 = vadd.f32 %v2729_v34, %v2544_v11 }
 0xeb1   :  { %v2739_v40 = vrot.slane %v2738_v36, 4 }
 0xeb2   :  { %v2756_v41 = vsel %vm131_vm3, %v2754_v37, 0.0  ;;  %v2745_v42 = vsel %vm131_vm3, %v2737_v39, 0.0  ;;  %v2755_v43 = vmul.f32 %v2737_v39, %v2737_v39 }
 0xeb3   :  { %v2740_v55 = vadd.f32 %v2739_v40, %v2738_v36  ;;  %v2757_v44 = vrot.slane %v2756_v41, 4  ;;  %v2746_v45 = vrot.slane %v2745_v42, 4 }
 0xeb4   :  { %v2763_v46 = vsel %vm131_vm3, %v2755_v43, 0.0 }
 0xeb5   :  { %v2741_v30 = vrot.slane %v2740_v55, 2  ;;  %v2758_v47 = vadd.f32 %v2757_v44, %v2756_v41  ;;  %v2747_v48 = vadd.f32 %v2746_v45, %v2745_v42  ;;  %v2764_v62 = vrot.slane %v2763_v46, 4 }
 0xeb7   :  { %v2742_v49 = vadd.f32 %v2741_v30, %v2740_v55  ;;  %v2759_v16 = vrot.slane %v2758_v47, 2  ;;  %v2748_v50 = vrot.slane %v2747_v48, 2  ;;  %v2765_v38 = vadd.f32 %v2764_v62, %v2763_v46 }
 0xeb9   :  { %v2743_v51 = vrot.slane %v2742_v49, 1  ;;  %v2760_v25 = vadd.f32 %v2759_v16, %v2758_v47  ;;  %v2749_v52 = vadd.f32 %v2748_v50, %v2747_v48  ;;  %v2766_v53 = vrot.slane %v2765_v38, 2 }
 0xebb   :  { %v2744_v54 = vadd.f32 %v2743_v51, %v2742_v49  ;;  %v2761_v56 = vrot.slane %v2760_v25, 1  ;;  %v2750_v58 = vrot.slane %v2749_v52, 1  ;;  %v2767_v59 = vadd.f32 %v2766_v53, %v2765_v38 }
 0xebd   :  { %v2752_v60 = vmul.f32 0.125, %v2744_v54  ;;  %v2762_v57 = vadd.f32 %v2761_v56, %v2760_v25  ;;  %v2751_v61 = vadd.f32 %v2750_v58, %v2749_v52  ;;  %v2768_v26 = vrot.slane %v2767_v59, 1 }
 0xebf   :  { %v2770_v0 = vmul.f32 0.125, %v2762_v57  ;;  %v2772_v63 = vmul.f32 %v2752_v60, %v2752_v60  ;;  %v2753_v1 = vmul.f32 0.125, %v2751_v61  ;;  %v2769_v3 = vadd.f32 %v2768_v26, %v2767_v59 }
 0xec0   :  { %v2776_v6 = vsub.f32 %v2736_v33, %v2752_v60 }
 0xec1   :  { %v2774_v4 = vsub.f32 %v2770_v0, %v2772_v63  ;;  %v2773_v35 = vmul.f32 %v2753_v1, %v2753_v1  ;;  %v2771_v5 = vmul.f32 0.125, %v2769_v3  ;;  %v2777_v10 = vsub.f32 %v2737_v39, %v2753_v1 }
 0xec3   :  { %v2778_v7 = vadd.f32 1e-05, %v2774_v4  ;;  %v2775_v8 = vsub.f32 %v2771_v5, %v2773_v35 }
 0xec5   :  { %3453 = vrsqrt.f32 %v2778_v7  ;;  %v2779_v9 = vadd.f32 1e-05, %v2775_v8 }
 0xec7   :  { %3455 = vrsqrt.f32 %v2779_v9 }
 0xecf   :  { %v3454_v11 = vpop.eup %3453 }
 0xed0   :  { %v2782_v18 = vmul.f32 %v3454_v11, %v2776_v6 }
 0xed1   :  { %v3456_v13 = vpop.eup %3455 }
 0xed2   :  { %v2790_v20 = vmul.f32 %v2927_v12, %v2782_v18  ;;  %v2783_v21 = vmul.f32 %v3456_v13, %v2777_v10 }
 0xed4   :  { %v2798_v22 = vadd.f32 %v2928_v19, %v2790_v20  ;;  %v2791_v17 = vmul.f32 %v2927_v12, %v2783_v21 }
 0xed6   :  { %2800 = vst.msk [vmem:[#allocation2] sm:$0xff] %vm131_vm3, %v2798_v22  ;;  %v2799_v27 = vadd.f32 %v2928_v19, %v2791_v17 }
 0xed8   :  { %2801 = vst.msk [vmem:[#allocation2 + $0x8] sm:$0xff] %vm131_vm3, %v2799_v27 }
 0xed9   :  { %3468 = shalt.err (!%p3465_p4)
}
 0xeda   :  { %s3469_s29 = scalar_lea.hbm %s4165_s13, 256 }
 0xedb   :  { %p3470_p5 = scmp.ne.s32.totalorder %s4165_s13, %s3469_s29  ;;  %p3473_p6 = scmp.lt.u32.totalorder %s3469_s29, %s4165_s13 }
 0xedd   :  { %p3475_p7 = pnand %p3473_p6, %p3470_p5 }
 0xedf   :  { %3478 = shalt.err (!%p3475_p7)
}
 0xee0   :  { %s3491_s15 = smov 128   ;;  %s3492_s16 = smov 8  }
 0xee1   :  { %2813 = dma.vmem_to_hbm [thread:$0]  %s2808_s27, 256, %s4165_s13, [#allocation3], %s3491_s15, %s3491_s15, %s3492_s16  }
 0xee2   :  { %3479 = dma.done.wait [#allocation3], 256  }
 0xee3   :  { %3480 = vsyncadd [#allocation3], 4294967040 }
 0xee4   :  { %2817 = vsyncpa [#allocation3], 1 }

</bundles_post_ra>
